<compile_context>
chip_gen: v7x
topology: tpu7x:2x2x1
jax: 0.10.0
libtpu: 0.0.40
codegen_flags: <defaults>
</compile_context>

<pallas_src>
import functools

import jax
import jax.numpy as jnp
from jax import lax
from jax.experimental import pallas as pl
from jax.experimental.pallas import tpu as pltpu

_BN_EPS = 1e-5
_TM_MAX = 1024                      # rows per tile (sweepable 1024-2048)
_VMEM_LIMIT = 32 * 1024 * 1024      # explicit scoped-VMEM ceiling (safe on v5e/v6e/v7x)


def _round_up(x, m):
  return (x + m - 1) // m * m


# ------------------------------ Pallas kernels --------------------------------
def _matmul_stats_kernel(p_ref, w_ref, y_ref, s_ref, *, m_total):
  """Pass A: conv-as-matmul (bf16 MXU, f32 acc) + per-tile partial batch statistics.

  p_ref: [tm, K]    bf16 im2col patches (rows past m_total in the last tile are garbage)
  w_ref: [K, C]     bf16 conv weight (C = true c_out, no lane padding)
  y_ref: [tm, C]    bf16 conv output tile (f32 accumulate, cast at store; OOB rows dropped)
  s_ref: [1, 2, C]  f32 per-tile partial (sum, sumsq) over the VALID rows only
  """
  i = pl.program_id(0)
  tm = p_ref.shape[0]

  y = jnp.dot(p_ref[...], w_ref[...], preferred_element_type=jnp.float32)
  y_ref[...] = y.astype(y_ref.dtype)

  # Mask the tail rows of the final (partial) tile out of the statistics.
  rows = lax.broadcasted_iota(jnp.int32, (tm, 1), 0)
  ym = jnp.where(rows < (m_total - i * tm), y, 0.0)
  s_ref[0:1, 0:1, :] = jnp.sum(ym, axis=0, keepdims=True)[None]
  s_ref[0:1, 1:2, :] = jnp.sum(ym * ym, axis=0, keepdims=True)[None]


def _bn_relu_kernel(y_ref, ss_ref, o_ref):
  """Pass B: folded-BN affine + ReLU.  f32 math (v5e-friendly), cast only at the store."""
  y = y_ref[...].astype(jnp.float32)
  o_ref[...] = jnp.maximum(y * ss_ref[0:1, :] + ss_ref[1:2, :], 0.0).astype(o_ref.dtype)


# -------------------------------- JAX glue ------------------------------------
def _im2col_nhwc(x, kh, kw, stride, pad):
  """x: [N,H,W,C] -> patches [N*Ho*Wo, kh*kw*C] in (kh, kw, c) order, c fastest."""
  n, h, w, c = x.shape
  xp = jnp.pad(x, ((0, 0), (pad, pad), (pad, pad), (0, 0)))
  ho = (h + 2 * pad - kh) // stride + 1
  wo = (w + 2 * pad - kw) // stride + 1
  cols = [xp[:, i:i + stride * ho:stride, j:j + stride * wo:stride, :]
          for i in range(kh) for j in range(kw)]
  p = jnp.stack(cols, axis=3).reshape(n * ho * wo, kh * kw * c)
  return p, ho, wo


def _conv_bn_relu_nhwc(x, w_oihw, gamma, beta, *, stride, pad, w_scale=1.0,
                       out_dtype=jnp.float32, tm_max=_TM_MAX):
  """One fused conv + batch-stat BN + ReLU layer. x: [N,H,W,Cin] -> [N,Ho,Wo,Cout]."""
  n = x.shape[0]
  c_out, _, kh, kw = w_oihw.shape

  # im2col on bf16 activations (halves DMA bytes; feeds a single bf16 MXU pass).
  patches, ho, wo = _im2col_nhwc(x.astype(jnp.bfloat16), kh, kw, stride, pad)
  m, k = patches.shape

  # Weight: OIHW -> [K, Cout] in (kh, kw, cin) order; fold optional prescale (x/255) into
  # the weight.  Conv bias is omitted on purpose (cancelled by BN mean subtraction).
  w2d = ((w_oihw.astype(jnp.float32) * w_scale)
         .transpose(2, 3, 1, 0).reshape(k, c_out).astype(jnp.bfloat16))

  tm = min(tm_max, _round_up(m, 32))
  n_tiles = (m + tm - 1) // tm
  grid = (n_tiles,)

  # ---- Pass A: matmul + per-tile partial stats (fully parallel grid -> v7x megacore).
  kernel_a = functools.partial(_matmul_stats_kernel, m_total=m)
  y, part = pl.pallas_call(
      kernel_a,
      grid=grid,
      in_specs=[
          pl.BlockSpec((tm, k), lambda i: (i, 0)),
          pl.BlockSpec((k, c_out), lambda i: (0, 0)),
      ],
      out_specs=(
          pl.BlockSpec((tm, c_out), lambda i: (i, 0)),
          pl.BlockSpec((1, 2, c_out), lambda i: (i, 0, 0)),
      ),
      out_shape=(
          jax.ShapeDtypeStruct((m, c_out), jnp.bfloat16),
          jax.ShapeDtypeStruct((n_tiles, 2, c_out), jnp.float32),
      ),
      compiler_params=pltpu.CompilerParams(
          dimension_semantics=("parallel",),
          vmem_limit_bytes=_VMEM_LIMIT),
  )(patches, w2d)

  # ---- Tiny XLA epilogue: combine partials -> folded per-channel (scale, shift).
  tot = jnp.sum(part, axis=0)                               # (2, c_out) f32
  mean = tot[0] / m
  # Biased batch variance (torch training-mode BN).  TODO(synk): for very large M switch
  # to centered per-tile partials to avoid E[y^2] - mean^2 cancellation.
  var = jnp.maximum(tot[1] / m - mean * mean, 0.0)
  scale = gamma.astype(jnp.float32) * lax.rsqrt(var + _BN_EPS)
  shift = beta.astype(jnp.float32) - mean * scale
  ss = jnp.stack([scale, shift], axis=0)                    # (2, c_out)

  # ---- Pass B: per-tile affine + ReLU.
  out = pl.pallas_call(
      _bn_relu_kernel,
      grid=grid,
      in_specs=[
          pl.BlockSpec((tm, c_out), lambda i: (i, 0)),
          pl.BlockSpec((2, c_out), lambda i: (0, 0)),
      ],
      out_specs=pl.BlockSpec((tm, c_out), lambda i: (i, 0)),
      out_shape=jax.ShapeDtypeStruct((m, c_out), out_dtype),
      compiler_params=pltpu.CompilerParams(
          dimension_semantics=("parallel",),
          vmem_limit_bytes=_VMEM_LIMIT),
  )(y, ss)

  return out.reshape(n, ho, wo, c_out)


def cnn_feature_extractor(x, params, tm_max=_TM_MAX):
  """x: [N, 4, H, W] float32 in [0, 255]. Returns [N, 128*H3*W3] float32."""
  h = x.transpose(0, 2, 3, 1)                               # NCHW -> NHWC once
  h = _conv_bn_relu_nhwc(h, params["w1"], params["g1"], params["bt1"],
                         stride=4, pad=1, w_scale=1.0 / 255.0,
                         out_dtype=jnp.bfloat16, tm_max=tm_max)
  h = _conv_bn_relu_nhwc(h, params["w2"], params["g2"], params["bt2"],
                         stride=2, pad=1, out_dtype=jnp.bfloat16, tm_max=tm_max)
  h = _conv_bn_relu_nhwc(h, params["w3"], params["g3"], params["bt3"],
                         stride=1, pad=1, out_dtype=jnp.float32, tm_max=tm_max)
  # Single NHWC->NCHW shuffle so the flatten matches torch's x.view(N, -1) on NCHW.
  return h.transpose(0, 3, 1, 2).reshape(h.shape[0], -1)


# --------------------------- deterministic parameters --------------------------
def init_params(key):
  def conv_init(k, c_out, c_in, kh, kw):
    fan_in = c_in * kh * kw
    bound = 1.0 / (fan_in ** 0.5)
    kw_, kb_ = jax.random.split(k)
    w = jax.random.uniform(kw_, (c_out, c_in, kh, kw), jnp.float32, -bound, bound)
    b = jax.random.uniform(kb_, (c_out,), jnp.float32, -bound, bound)
    return w, b

  def bn_init(k, c):
    kg, kb = jax.random.split(k)
    g = 1.0 + 0.1 * jax.random.normal(kg, (c,), jnp.float32)   # exercise the affine fold
    bt = 0.1 * jax.random.normal(kb, (c,), jnp.float32)
    return g, bt

  k1, k2, k3, k4, k5, k6 = jax.random.split(key, 6)
  w1, b1 = conv_init(k1, 32, 4, 8, 8)
  w2, b2 = conv_init(k2, 64, 32, 4, 4)
  w3, b3 = conv_init(k3, 128, 64, 3, 3)
  g1, bt1 = bn_init(k4, 32)
  g2, bt2 = bn_init(k5, 64)
  g3, bt3 = bn_init(k6, 128)
  return dict(w1=w1, b1=b1, g1=g1, bt1=bt1,
              w2=w2, b2=b2, g2=g2, bt2=bt2,
              w3=w3, b3=b3, g3=g3, bt3=bt3)


# ------------------------------- references ------------------------------------
def _reference_f32(x, params):
  """Pure-f32 reference with the original module's semantics (incl. conv bias)."""
  def conv(x, w, b, stride, pad):
    y = lax.conv_general_dilated(
        x, w, (stride, stride), [(pad, pad), (pad, pad)],
        dimension_numbers=("NCHW", "OIHW", "NCHW"),
        precision=lax.Precision.HIGHEST)
    return y + b.reshape(1, -1, 1, 1)

  def bn_relu(y, g, bt):
    mean = jnp.mean(y, axis=(0, 2, 3), keepdims=True)
    var = jnp.mean((y - mean) ** 2, axis=(0, 2, 3), keepdims=True)
    yh = (y - mean) / jnp.sqrt(var + _BN_EPS)
    return jnp.maximum(yh * g.reshape(1, -1, 1, 1) + bt.reshape(1, -1, 1, 1), 0.0)

  x = x / 255.0
  x = bn_relu(conv(x, params["w1"], params["b1"], 4, 1), params["g1"], params["bt1"])
  x = bn_relu(conv(x, params["w2"], params["b2"], 2, 1), params["g2"], params["bt2"])
  x = bn_relu(conv(x, params["w3"], params["b3"], 1, 1), params["g3"], params["bt3"])
  return x.reshape(x.shape[0], -1)


def _reference_bf16(x, params):
  """Mirrors the kernel's numerics: bf16 MXU operands with f32 accumulation, BN stats from
  the pre-cast f32 conv result, affine applied to the bf16-rounded conv result, bf16
  inter-layer activations, x/255 folded into w1, conv bias dropped (cancelled by BN)."""
  def conv(x, w, stride, pad, w_scale=1.0):
    return lax.conv_general_dilated(
        x.astype(jnp.bfloat16), (w * w_scale).astype(jnp.bfloat16),
        (stride, stride), [(pad, pad), (pad, pad)],
        dimension_numbers=("NCHW", "OIHW", "NCHW"),
        preferred_element_type=jnp.float32)

  def bn_relu(y, g, bt):
    mean = jnp.mean(y, axis=(0, 2, 3), keepdims=True)
    var = jnp.maximum(jnp.mean(y * y, axis=(0, 2, 3), keepdims=True) - mean * mean, 0.0)
    scale = g.reshape(1, -1, 1, 1) * lax.rsqrt(var + _BN_EPS)
    shift = bt.reshape(1, -1, 1, 1) - mean * scale
    yq = y.astype(jnp.bfloat16).astype(jnp.float32)   # kernel stores y in bf16
    return jnp.maximum(yq * scale + shift, 0.0)

  a1 = bn_relu(conv(x, params["w1"], 4, 1, 1.0 / 255.0),
               params["g1"], params["bt1"]).astype(jnp.bfloat16)
  a2 = bn_relu(conv(a1, params["w2"], 2, 1),
               params["g2"], params["bt2"]).astype(jnp.bfloat16)
  a3 = bn_relu(conv(a2, params["w3"], 1, 1), params["g3"], params["bt3"])
  return a3.reshape(a3.shape[0], -1)


# ------------------------------------ main --------------------------------------
if __name__ == "__main__":
  key = jax.random.PRNGKey(0)
  pkey, xkey = jax.random.split(key)
  params = init_params(pkey)

  # Small NCHW input consistent with the module (4 input channels, 0..255 pixels).
  x = jax.random.uniform(xkey, (2, 4, 32, 32), jnp.float32, 0.0, 255.0)

  out = jax.block_until_ready(jax.jit(cnn_feature_extractor)(x, params))

  # 32x32 -> conv1: 7x7 -> conv2: 3x3 -> conv3: 3x3  =>  128*3*3 = 1152 features
  assert out.shape == (2, 1152), out.shape

  # (1) Implementation check: elementwise match against a reference applying the same
  #     bf16 rounding (remaining diffs are accumulation-order only).
  ref_bf16 = jax.block_until_ready(jax.jit(_reference_bf16)(x, params))
  max_err = float(jnp.max(jnp.abs(out - ref_bf16)))
  assert jnp.allclose(out, ref_bf16, rtol=5e-3, atol=5e-3), max_err

  # (2) Multi-tile path (grid > 1): exercises tail-row masking + per-tile stats combine.
  out_tiled = jax.block_until_ready(
      jax.jit(functools.partial(cnn_feature_extractor, tm_max=32))(x, params))
  max_err_t = float(jnp.max(jnp.abs(out_tiled - ref_bf16)))
  assert jnp.allclose(out_tiled, ref_bf16, rtol=5e-3, atol=5e-3), max_err_t

  # (3) Numerics check against the full-f32 module semantics (incl. conv bias): bf16 MXU
  #     operands give ~1e-3..1e-2-scale deviations after three BN-normalized layers.
  ref_f32 = jax.block_until_ready(jax.jit(_reference_f32)(x, params))
  rel_l2 = float(jnp.linalg.norm(out - ref_f32) / jnp.linalg.norm(ref_f32))
  assert rel_l2 < 5e-2, rel_l2

  print("KERNEL_OK")
</pallas_src>

<mosaic_0001>
module attributes {stable_mosaic.version = 11 : i64} {
  func.func @_matmul_stats_kernel(%arg0: i32, %arg1: memref<128x256xbf16, #tpu.memory_space<vmem>>, %arg2: memref<256x32xbf16, #tpu.memory_space<vmem>>, %arg3: memref<128x32xbf16, #tpu.memory_space<vmem>>, %arg4: memref<1x2x32xf32, #tpu.memory_space<vmem>>) attributes {dimension_semantics = [#tpu.dimension_semantics<parallel>], iteration_bounds = array<i64: 1>, scalar_prefetch = 0 : i64, scratch_operands = 0 : i64, tpu.core_type = #tpu.core_type<tc>, window_params = [{transform_indices = @transform_0, window_bounds = array<i64: 128, 256>}, {pipeline_mode = #tpu.pipeline_mode<synchronous>, transform_indices = @transform_1, window_bounds = array<i64: 256, 32>}, {transform_indices = @transform_2, window_bounds = array<i64: 128, 32>}, {transform_indices = @transform_3, window_bounds = array<i64: 1, 2, 32>}]} {
    %c0 = arith.constant 0 : index
    %c0_0 = arith.constant 0 : index
    %0 = vector.load %arg1[%c0, %c0_0] : memref<128x256xbf16, #tpu.memory_space<vmem>>, vector<128x256xbf16>
    %c0_1 = arith.constant 0 : index
    %c0_2 = arith.constant 0 : index
    %1 = vector.load %arg2[%c0_1, %c0_2] : memref<256x32xbf16, #tpu.memory_space<vmem>>, vector<256x32xbf16>
    %cst = arith.constant dense<0.000000e+00> : vector<128x32xf32>
    %2 = tpu.matmul %0, %1, %cst {dimension_numbers = #tpu.dot_dimension_numbers<[1], [0], [0], [1], [0, 0, 1, 1], [], []>} : vector<128x256xbf16>, vector<256x32xbf16>, vector<128x32xf32> -> vector<128x32xf32>
    %3 = arith.truncf %2 : vector<128x32xf32> to vector<128x32xbf16>
    %c0_3 = arith.constant 0 : index
    %c0_4 = arith.constant 0 : index
    %4 = vector.load %arg3[%c0_3, %c0_4] : memref<128x32xbf16, #tpu.memory_space<vmem>>, vector<128x32xbf16>
    tpu.vector_store %arg3[%c0_3, %c0_4], %3 {strides = array<i32>} : memref<128x32xbf16, #tpu.memory_space<vmem>>, vector<128x32xbf16>,
    %5 = tpu.iota {dimensions = array<i32: 0>} : vector<128x1xi32>
    %c128_i32 = arith.constant 128 : i32
    %6 = arith.muli %arg0, %c128_i32 : i32
    %c98_i32 = arith.constant 98 : i32
    %7 = arith.subi %c98_i32, %6 : i32
    %8 = vector.broadcast %7 : i32 to vector<128x1xi32>
    %9 = arith.cmpi slt, %5, %8 : vector<128x1xi32>
    %cst_5 = arith.constant 0.000000e+00 : f32
    %10 = vector.shape_cast %9 : vector<128x1xi1> to vector<128x1xi1>
    %11 = vector.broadcast %10 : vector<128x1xi1> to vector<128x32xi1>
    %12 = vector.broadcast %cst_5 : f32 to vector<128x32xf32>
    %13 = arith.select %11, %2, %12 : vector<128x32xi1>, vector<128x32xf32>
    %cst_6 = arith.constant dense<0.000000e+00> : vector<32xf32>
    %14 = vector.multi_reduction <add>, %13, %cst_6 [0] : vector<128x32xf32> to vector<32xf32>
    %15 = vector.shape_cast %14 : vector<32xf32> to vector<1x32xf32>
    %16 = vector.shape_cast %15 : vector<1x32xf32> to vector<1x1x32xf32>
    %c0_7 = arith.constant 0 : index
    %c0_8 = arith.constant 0 : index
    %c0_9 = arith.constant 0 : index
    %17 = vector.load %arg4[%c0_7, %c0_8, %c0_9] : memref<1x2x32xf32, #tpu.memory_space<vmem>>, vector<1x1x32xf32>
    tpu.vector_store %arg4[%c0_7, %c0_8, %c0_9], %16 {strides = array<i32>} : memref<1x2x32xf32, #tpu.memory_space<vmem>>, vector<1x1x32xf32>,
    %18 = arith.mulf %13, %13 : vector<128x32xf32>
    %cst_10 = arith.constant dense<0.000000e+00> : vector<32xf32>
    %19 = vector.multi_reduction <add>, %18, %cst_10 [0] : vector<128x32xf32> to vector<32xf32>
    %20 = vector.shape_cast %19 : vector<32xf32> to vector<1x32xf32>
    %21 = vector.shape_cast %20 : vector<1x32xf32> to vector<1x1x32xf32>
    %c0_11 = arith.constant 0 : index
    %c1 = arith.constant 1 : index
    %c0_12 = arith.constant 0 : index
    %22 = vector.load %arg4[%c0_11, %c1, %c0_12] : memref<1x2x32xf32, #tpu.memory_space<vmem>>, vector<1x1x32xf32>
    tpu.vector_store %arg4[%c0_11, %c1, %c0_12], %21 {strides = array<i32>} : memref<1x2x32xf32, #tpu.memory_space<vmem>>, vector<1x1x32xf32>,
    return
  }
  func.func @transform_0(%arg0: i32) -> (i32, i32) {
    %c0_i32 = arith.constant 0 : i32
    %c0_i32_0 = arith.constant 0 : i32
    return %arg0, %c0_i32 : i32, i32
  }
  func.func @transform_1(%arg0: i32) -> (i32, i32) {
    %c0_i32 = arith.constant 0 : i32
    %c0_i32_0 = arith.constant 0 : i32
    %c0_i32_1 = arith.constant 0 : i32
    return %c0_i32, %c0_i32_0 : i32, i32
  }
  func.func @transform_2(%arg0: i32) -> (i32, i32) {
    %c0_i32 = arith.constant 0 : i32
    %c0_i32_0 = arith.constant 0 : i32
    return %arg0, %c0_i32 : i32, i32
  }
  func.func @transform_3(%arg0: i32) -> (i32, i32, i32) {
    %c0_i32 = arith.constant 0 : i32
    %c0_i32_0 = arith.constant 0 : i32
    %c0_i32_1 = arith.constant 0 : i32
    return %arg0, %c0_i32, %c0_i32_0 : i32, i32, i32
  }
}

module attributes {stable_mosaic.version = 11 : i64} {
  func.func @_bn_relu_kernel(%arg0: i32, %arg1: memref<128x32xbf16, #tpu.memory_space<vmem>>, %arg2: memref<2x32xf32, #tpu.memory_space<vmem>>, %arg3: memref<128x32xbf16, #tpu.memory_space<vmem>>) attributes {dimension_semantics = [#tpu.dimension_semantics<parallel>], iteration_bounds = array<i64: 1>, scalar_prefetch = 0 : i64, scratch_operands = 0 : i64, tpu.core_type = #tpu.core_type<tc>, window_params = [{transform_indices = @transform_0, window_bounds = array<i64: 128, 32>}, {pipeline_mode = #tpu.pipeline_mode<synchronous>, transform_indices = @transform_1, window_bounds = array<i64: 2, 32>}, {transform_indices = @transform_2, window_bounds = array<i64: 128, 32>}]} {
    %c0 = arith.constant 0 : index
    %c0_0 = arith.constant 0 : index
    %0 = vector.load %arg1[%c0, %c0_0] : memref<128x32xbf16, #tpu.memory_space<vmem>>, vector<128x32xbf16>
    %1 = arith.extf %0 : vector<128x32xbf16> to vector<128x32xf32>
    %c0_1 = arith.constant 0 : index
    %c0_2 = arith.constant 0 : index
    %2 = vector.load %arg2[%c0_1, %c0_2] : memref<2x32xf32, #tpu.memory_space<vmem>>, vector<1x32xf32>
    %3 = vector.broadcast %2 : vector<1x32xf32> to vector<128x32xf32>
    %4 = arith.mulf %1, %3 : vector<128x32xf32>
    %c1 = arith.constant 1 : index
    %c0_3 = arith.constant 0 : index
    %5 = vector.load %arg2[%c1, %c0_3] : memref<2x32xf32, #tpu.memory_space<vmem>>, vector<1x32xf32>
    %6 = vector.broadcast %5 : vector<1x32xf32> to vector<128x32xf32>
    %7 = arith.addf %4, %6 : vector<128x32xf32>
    %cst = arith.constant 0.000000e+00 : f32
    %8 = vector.broadcast %cst : f32 to vector<128x32xf32>
    %9 = arith.maximumf %7, %8 : vector<128x32xf32>
    %10 = arith.truncf %9 : vector<128x32xf32> to vector<128x32xbf16>
    %c0_4 = arith.constant 0 : index
    %c0_5 = arith.constant 0 : index
    %11 = vector.load %arg3[%c0_4, %c0_5] : memref<128x32xbf16, #tpu.memory_space<vmem>>, vector<128x32xbf16>
    tpu.vector_store %arg3[%c0_4, %c0_5], %10 {strides = array<i32>} : memref<128x32xbf16, #tpu.memory_space<vmem>>, vector<128x32xbf16>,
    return
  }
  func.func @transform_0(%arg0: i32) -> (i32, i32) {
    %c0_i32 = arith.constant 0 : i32
    %c0_i32_0 = arith.constant 0 : i32
    return %arg0, %c0_i32 : i32, i32
  }
  func.func @transform_1(%arg0: i32) -> (i32, i32) {
    %c0_i32 = arith.constant 0 : i32
    %c0_i32_0 = arith.constant 0 : i32
    %c0_i32_1 = arith.constant 0 : i32
    return %c0_i32, %c0_i32_0 : i32, i32
  }
  func.func @transform_2(%arg0: i32) -> (i32, i32) {
    %c0_i32 = arith.constant 0 : i32
    %c0_i32_0 = arith.constant 0 : i32
    return %arg0, %c0_i32 : i32, i32
  }
}

module attributes {stable_mosaic.version = 11 : i64} {
  func.func @_matmul_stats_kernel(%arg0: i32, %arg1: memref<32x512xbf16, #tpu.memory_space<vmem>>, %arg2: memref<512x64xbf16, #tpu.memory_space<vmem>>, %arg3: memref<32x64xbf16, #tpu.memory_space<vmem>>, %arg4: memref<1x2x64xf32, #tpu.memory_space<vmem>>) attributes {dimension_semantics = [#tpu.dimension_semantics<parallel>], iteration_bounds = array<i64: 1>, scalar_prefetch = 0 : i64, scratch_operands = 0 : i64, tpu.core_type = #tpu.core_type<tc>, window_params = [{transform_indices = @transform_0, window_bounds = array<i64: 32, 512>}, {pipeline_mode = #tpu.pipeline_mode<synchronous>, transform_indices = @transform_1, window_bounds = array<i64: 512, 64>}, {transform_indices = @transform_2, window_bounds = array<i64: 32, 64>}, {transform_indices = @transform_3, window_bounds = array<i64: 1, 2, 64>}]} {
    %c0 = arith.constant 0 : index
    %c0_0 = arith.constant 0 : index
    %0 = vector.load %arg1[%c0, %c0_0] : memref<32x512xbf16, #tpu.memory_space<vmem>>, vector<32x512xbf16>
    %c0_1 = arith.constant 0 : index
    %c0_2 = arith.constant 0 : index
    %1 = vector.load %arg2[%c0_1, %c0_2] : memref<512x64xbf16, #tpu.memory_space<vmem>>, vector<512x64xbf16>
    %cst = arith.constant dense<0.000000e+00> : vector<32x64xf32>
    %2 = tpu.matmul %0, %1, %cst {dimension_numbers = #tpu.dot_dimension_numbers<[1], [0], [0], [1], [0, 0, 1, 1], [], []>} : vector<32x512xbf16>, vector<512x64xbf16>, vector<32x64xf32> -> vector<32x64xf32>
    %3 = arith.truncf %2 : vector<32x64xf32> to vector<32x64xbf16>
    %c0_3 = arith.constant 0 : index
    %c0_4 = arith.constant 0 : index
    %4 = vector.load %arg3[%c0_3, %c0_4] : memref<32x64xbf16, #tpu.memory_space<vmem>>, vector<32x64xbf16>
    tpu.vector_store %arg3[%c0_3, %c0_4], %3 {strides = array<i32>} : memref<32x64xbf16, #tpu.memory_space<vmem>>, vector<32x64xbf16>,
    %5 = tpu.iota {dimensions = array<i32: 0>} : vector<32x1xi32>
    %c32_i32 = arith.constant 32 : i32
    %6 = arith.muli %arg0, %c32_i32 : i32
    %c18_i32 = arith.constant 18 : i32
    %7 = arith.subi %c18_i32, %6 : i32
    %8 = vector.broadcast %7 : i32 to vector<32x1xi32>
    %9 = arith.cmpi slt, %5, %8 : vector<32x1xi32>
    %cst_5 = arith.constant 0.000000e+00 : f32
    %10 = vector.shape_cast %9 : vector<32x1xi1> to vector<32x1xi1>
    %11 = vector.broadcast %10 : vector<32x1xi1> to vector<32x64xi1>
    %12 = vector.broadcast %cst_5 : f32 to vector<32x64xf32>
    %13 = arith.select %11, %2, %12 : vector<32x64xi1>, vector<32x64xf32>
    %cst_6 = arith.constant dense<0.000000e+00> : vector<64xf32>
    %14 = vector.multi_reduction <add>, %13, %cst_6 [0] : vector<32x64xf32> to vector<64xf32>
    %15 = vector.shape_cast %14 : vector<64xf32> to vector<1x64xf32>
    %16 = vector.shape_cast %15 : vector<1x64xf32> to vector<1x1x64xf32>
    %c0_7 = arith.constant 0 : index
    %c0_8 = arith.constant 0 : index
    %c0_9 = arith.constant 0 : index
    %17 = vector.load %arg4[%c0_7, %c0_8, %c0_9] : memref<1x2x64xf32, #tpu.memory_space<vmem>>, vector<1x1x64xf32>
    tpu.vector_store %arg4[%c0_7, %c0_8, %c0_9], %16 {strides = array<i32>} : memref<1x2x64xf32, #tpu.memory_space<vmem>>, vector<1x1x64xf32>,
    %18 = arith.mulf %13, %13 : vector<32x64xf32>
    %cst_10 = arith.constant dense<0.000000e+00> : vector<64xf32>
    %19 = vector.multi_reduction <add>, %18, %cst_10 [0] : vector<32x64xf32> to vector<64xf32>
    %20 = vector.shape_cast %19 : vector<64xf32> to vector<1x64xf32>
    %21 = vector.shape_cast %20 : vector<1x64xf32> to vector<1x1x64xf32>
    %c0_11 = arith.constant 0 : index
    %c1 = arith.constant 1 : index
    %c0_12 = arith.constant 0 : index
    %22 = vector.load %arg4[%c0_11, %c1, %c0_12] : memref<1x2x64xf32, #tpu.memory_space<vmem>>, vector<1x1x64xf32>
    tpu.vector_store %arg4[%c0_11, %c1, %c0_12], %21 {strides = array<i32>} : memref<1x2x64xf32, #tpu.memory_space<vmem>>, vector<1x1x64xf32>,
    return
  }
  func.func @transform_0(%arg0: i32) -> (i32, i32) {
    %c0_i32 = arith.constant 0 : i32
    %c0_i32_0 = arith.constant 0 : i32
    return %arg0, %c0_i32 : i32, i32
  }
  func.func @transform_1(%arg0: i32) -> (i32, i32) {
    %c0_i32 = arith.constant 0 : i32
    %c0_i32_0 = arith.constant 0 : i32
    %c0_i32_1 = arith.constant 0 : i32
    return %c0_i32, %c0_i32_0 : i32, i32
  }
  func.func @transform_2(%arg0: i32) -> (i32, i32) {
    %c0_i32 = arith.constant 0 : i32
    %c0_i32_0 = arith.constant 0 : i32
    return %arg0, %c0_i32 : i32, i32
  }
  func.func @transform_3(%arg0: i32) -> (i32, i32, i32) {
    %c0_i32 = arith.constant 0 : i32
    %c0_i32_0 = arith.constant 0 : i32
    %c0_i32_1 = arith.constant 0 : i32
    return %arg0, %c0_i32, %c0_i32_0 : i32, i32, i32
  }
}

module attributes {stable_mosaic.version = 11 : i64} {
  func.func @_bn_relu_kernel(%arg0: i32, %arg1: memref<32x64xbf16, #tpu.memory_space<vmem>>, %arg2: memref<2x64xf32, #tpu.memory_space<vmem>>, %arg3: memref<32x64xbf16, #tpu.memory_space<vmem>>) attributes {dimension_semantics = [#tpu.dimension_semantics<parallel>], iteration_bounds = array<i64: 1>, scalar_prefetch = 0 : i64, scratch_operands = 0 : i64, tpu.core_type = #tpu.core_type<tc>, window_params = [{transform_indices = @transform_0, window_bounds = array<i64: 32, 64>}, {pipeline_mode = #tpu.pipeline_mode<synchronous>, transform_indices = @transform_1, window_bounds = array<i64: 2, 64>}, {transform_indices = @transform_2, window_bounds = array<i64: 32, 64>}]} {
    %c0 = arith.constant 0 : index
    %c0_0 = arith.constant 0 : index
    %0 = vector.load %arg1[%c0, %c0_0] : memref<32x64xbf16, #tpu.memory_space<vmem>>, vector<32x64xbf16>
    %1 = arith.extf %0 : vector<32x64xbf16> to vector<32x64xf32>
    %c0_1 = arith.constant 0 : index
    %c0_2 = arith.constant 0 : index
    %2 = vector.load %arg2[%c0_1, %c0_2] : memref<2x64xf32, #tpu.memory_space<vmem>>, vector<1x64xf32>
    %3 = vector.broadcast %2 : vector<1x64xf32> to vector<32x64xf32>
    %4 = arith.mulf %1, %3 : vector<32x64xf32>
    %c1 = arith.constant 1 : index
    %c0_3 = arith.constant 0 : index
    %5 = vector.load %arg2[%c1, %c0_3] : memref<2x64xf32, #tpu.memory_space<vmem>>, vector<1x64xf32>
    %6 = vector.broadcast %5 : vector<1x64xf32> to vector<32x64xf32>
    %7 = arith.addf %4, %6 : vector<32x64xf32>
    %cst = arith.constant 0.000000e+00 : f32
    %8 = vector.broadcast %cst : f32 to vector<32x64xf32>
    %9 = arith.maximumf %7, %8 : vector<32x64xf32>
    %10 = arith.truncf %9 : vector<32x64xf32> to vector<32x64xbf16>
    %c0_4 = arith.constant 0 : index
    %c0_5 = arith.constant 0 : index
    %11 = vector.load %arg3[%c0_4, %c0_5] : memref<32x64xbf16, #tpu.memory_space<vmem>>, vector<32x64xbf16>
    tpu.vector_store %arg3[%c0_4, %c0_5], %10 {strides = array<i32>} : memref<32x64xbf16, #tpu.memory_space<vmem>>, vector<32x64xbf16>,
    return
  }
  func.func @transform_0(%arg0: i32) -> (i32, i32) {
    %c0_i32 = arith.constant 0 : i32
    %c0_i32_0 = arith.constant 0 : i32
    return %arg0, %c0_i32 : i32, i32
  }
  func.func @transform_1(%arg0: i32) -> (i32, i32) {
    %c0_i32 = arith.constant 0 : i32
    %c0_i32_0 = arith.constant 0 : i32
    %c0_i32_1 = arith.constant 0 : i32
    return %c0_i32, %c0_i32_0 : i32, i32
  }
  func.func @transform_2(%arg0: i32) -> (i32, i32) {
    %c0_i32 = arith.constant 0 : i32
    %c0_i32_0 = arith.constant 0 : i32
    return %arg0, %c0_i32 : i32, i32
  }
}

module attributes {stable_mosaic.version = 11 : i64} {
  func.func @_matmul_stats_kernel(%arg0: i32, %arg1: memref<32x576xbf16, #tpu.memory_space<vmem>>, %arg2: memref<576x128xbf16, #tpu.memory_space<vmem>>, %arg3: memref<32x128xbf16, #tpu.memory_space<vmem>>, %arg4: memref<1x2x128xf32, #tpu.memory_space<vmem>>) attributes {dimension_semantics = [#tpu.dimension_semantics<parallel>], iteration_bounds = array<i64: 1>, scalar_prefetch = 0 : i64, scratch_operands = 0 : i64, tpu.core_type = #tpu.core_type<tc>, window_params = [{transform_indices = @transform_0, window_bounds = array<i64: 32, 576>}, {pipeline_mode = #tpu.pipeline_mode<synchronous>, transform_indices = @transform_1, window_bounds = array<i64: 576, 128>}, {transform_indices = @transform_2, window_bounds = array<i64: 32, 128>}, {transform_indices = @transform_3, window_bounds = array<i64: 1, 2, 128>}]} {
    %c0 = arith.constant 0 : index
    %c0_0 = arith.constant 0 : index
    %0 = vector.load %arg1[%c0, %c0_0] : memref<32x576xbf16, #tpu.memory_space<vmem>>, vector<32x576xbf16>
    %c0_1 = arith.constant 0 : index
    %c0_2 = arith.constant 0 : index
    %1 = vector.load %arg2[%c0_1, %c0_2] : memref<576x128xbf16, #tpu.memory_space<vmem>>, vector<576x128xbf16>
    %cst = arith.constant dense<0.000000e+00> : vector<32x128xf32>
    %2 = tpu.matmul %0, %1, %cst {dimension_numbers = #tpu.dot_dimension_numbers<[1], [0], [0], [1], [0, 0, 1, 1], [], []>} : vector<32x576xbf16>, vector<576x128xbf16>, vector<32x128xf32> -> vector<32x128xf32>
    %3 = arith.truncf %2 : vector<32x128xf32> to vector<32x128xbf16>
    %c0_3 = arith.constant 0 : index
    %c0_4 = arith.constant 0 : index
    %4 = vector.load %arg3[%c0_3, %c0_4] : memref<32x128xbf16, #tpu.memory_space<vmem>>, vector<32x128xbf16>
    tpu.vector_store %arg3[%c0_3, %c0_4], %3 {strides = array<i32>} : memref<32x128xbf16, #tpu.memory_space<vmem>>, vector<32x128xbf16>,
    %5 = tpu.iota {dimensions = array<i32: 0>} : vector<32x1xi32>
    %c32_i32 = arith.constant 32 : i32
    %6 = arith.muli %arg0, %c32_i32 : i32
    %c18_i32 = arith.constant 18 : i32
    %7 = arith.subi %c18_i32, %6 : i32
    %8 = vector.broadcast %7 : i32 to vector<32x1xi32>
    %9 = arith.cmpi slt, %5, %8 : vector<32x1xi32>
    %cst_5 = arith.constant 0.000000e+00 : f32
    %10 = vector.shape_cast %9 : vector<32x1xi1> to vector<32x1xi1>
    %11 = vector.broadcast %10 : vector<32x1xi1> to vector<32x128xi1>
    %12 = vector.broadcast %cst_5 : f32 to vector<32x128xf32>
    %13 = arith.select %11, %2, %12 : vector<32x128xi1>, vector<32x128xf32>
    %cst_6 = arith.constant dense<0.000000e+00> : vector<128xf32>
    %14 = vector.multi_reduction <add>, %13, %cst_6 [0] : vector<32x128xf32> to vector<128xf32>
    %15 = vector.shape_cast %14 : vector<128xf32> to vector<1x128xf32>
    %16 = vector.shape_cast %15 : vector<1x128xf32> to vector<1x1x128xf32>
    %c0_7 = arith.constant 0 : index
    %c0_8 = arith.constant 0 : index
    %c0_9 = arith.constant 0 : index
    %17 = vector.load %arg4[%c0_7, %c0_8, %c0_9] : memref<1x2x128xf32, #tpu.memory_space<vmem>>, vector<1x1x128xf32>
    tpu.vector_store %arg4[%c0_7, %c0_8, %c0_9], %16 {strides = array<i32>} : memref<1x2x128xf32, #tpu.memory_space<vmem>>, vector<1x1x128xf32>,
    %18 = arith.mulf %13, %13 : vector<32x128xf32>
    %cst_10 = arith.constant dense<0.000000e+00> : vector<128xf32>
    %19 = vector.multi_reduction <add>, %18, %cst_10 [0] : vector<32x128xf32> to vector<128xf32>
    %20 = vector.shape_cast %19 : vector<128xf32> to vector<1x128xf32>
    %21 = vector.shape_cast %20 : vector<1x128xf32> to vector<1x1x128xf32>
    %c0_11 = arith.constant 0 : index
    %c1 = arith.constant 1 : index
    %c0_12 = arith.constant 0 : index
    %22 = vector.load %arg4[%c0_11, %c1, %c0_12] : memref<1x2x128xf32, #tpu.memory_space<vmem>>, vector<1x1x128xf32>
    tpu.vector_store %arg4[%c0_11, %c1, %c0_12], %21 {strides = array<i32>} : memref<1x2x128xf32, #tpu.memory_space<vmem>>, vector<1x1x128xf32>,
    return
  }
  func.func @transform_0(%arg0: i32) -> (i32, i32) {
    %c0_i32 = arith.constant 0 : i32
    %c0_i32_0 = arith.constant 0 : i32
    return %arg0, %c0_i32 : i32, i32
  }
  func.func @transform_1(%arg0: i32) -> (i32, i32) {
    %c0_i32 = arith.constant 0 : i32
    %c0_i32_0 = arith.constant 0 : i32
    %c0_i32_1 = arith.constant 0 : i32
    return %c0_i32, %c0_i32_0 : i32, i32
  }
  func.func @transform_2(%arg0: i32) -> (i32, i32) {
    %c0_i32 = arith.constant 0 : i32
    %c0_i32_0 = arith.constant 0 : i32
    return %arg0, %c0_i32 : i32, i32
  }
  func.func @transform_3(%arg0: i32) -> (i32, i32, i32) {
    %c0_i32 = arith.constant 0 : i32
    %c0_i32_0 = arith.constant 0 : i32
    %c0_i32_1 = arith.constant 0 : i32
    return %arg0, %c0_i32, %c0_i32_0 : i32, i32, i32
  }
}

module attributes {stable_mosaic.version = 11 : i64} {
  func.func @_bn_relu_kernel(%arg0: i32, %arg1: memref<32x128xbf16, #tpu.memory_space<vmem>>, %arg2: memref<2x128xf32, #tpu.memory_space<vmem>>, %arg3: memref<32x128xf32, #tpu.memory_space<vmem>>) attributes {dimension_semantics = [#tpu.dimension_semantics<parallel>], iteration_bounds = array<i64: 1>, scalar_prefetch = 0 : i64, scratch_operands = 0 : i64, tpu.core_type = #tpu.core_type<tc>, window_params = [{transform_indices = @transform_0, window_bounds = array<i64: 32, 128>}, {pipeline_mode = #tpu.pipeline_mode<synchronous>, transform_indices = @transform_1, window_bounds = array<i64: 2, 128>}, {transform_indices = @transform_2, window_bounds = array<i64: 32, 128>}]} {
    %c0 = arith.constant 0 : index
    %c0_0 = arith.constant 0 : index
    %0 = vector.load %arg1[%c0, %c0_0] : memref<32x128xbf16, #tpu.memory_space<vmem>>, vector<32x128xbf16>
    %1 = arith.extf %0 : vector<32x128xbf16> to vector<32x128xf32>
    %c0_1 = arith.constant 0 : index
    %c0_2 = arith.constant 0 : index
    %2 = vector.load %arg2[%c0_1, %c0_2] : memref<2x128xf32, #tpu.memory_space<vmem>>, vector<1x128xf32>
    %3 = vector.broadcast %2 : vector<1x128xf32> to vector<32x128xf32>
    %4 = arith.mulf %1, %3 : vector<32x128xf32>
    %c1 = arith.constant 1 : index
    %c0_3 = arith.constant 0 : index
    %5 = vector.load %arg2[%c1, %c0_3] : memref<2x128xf32, #tpu.memory_space<vmem>>, vector<1x128xf32>
    %6 = vector.broadcast %5 : vector<1x128xf32> to vector<32x128xf32>
    %7 = arith.addf %4, %6 : vector<32x128xf32>
    %cst = arith.constant 0.000000e+00 : f32
    %8 = vector.broadcast %cst : f32 to vector<32x128xf32>
    %9 = arith.maximumf %7, %8 : vector<32x128xf32>
    %c0_4 = arith.constant 0 : index
    %c0_5 = arith.constant 0 : index
    %10 = vector.load %arg3[%c0_4, %c0_5] : memref<32x128xf32, #tpu.memory_space<vmem>>, vector<32x128xf32>
    tpu.vector_store %arg3[%c0_4, %c0_5], %9 {strides = array<i32>} : memref<32x128xf32, #tpu.memory_space<vmem>>, vector<32x128xf32>,
    return
  }
  func.func @transform_0(%arg0: i32) -> (i32, i32) {
    %c0_i32 = arith.constant 0 : i32
    %c0_i32_0 = arith.constant 0 : i32
    return %arg0, %c0_i32 : i32, i32
  }
  func.func @transform_1(%arg0: i32) -> (i32, i32) {
    %c0_i32 = arith.constant 0 : i32
    %c0_i32_0 = arith.constant 0 : i32
    %c0_i32_1 = arith.constant 0 : i32
    return %c0_i32, %c0_i32_0 : i32, i32
  }
  func.func @transform_2(%arg0: i32) -> (i32, i32) {
    %c0_i32 = arith.constant 0 : i32
    %c0_i32_0 = arith.constant 0 : i32
    return %arg0, %c0_i32 : i32, i32
  }
}

</mosaic_0001>

<bundles_post_ra>
// kernel: cnn_feature_extractor.7
= control target key start
LH: loop header
LB: loop body
LE: loop exit
PB: predicated region body
PF: predicated region fallthrough
CT: control target
= control target key end

     0   :  { %vm165_vm0 = vcmask 257024   ;;  %s456_s0 = inlined_call_operand.vmem [shape: bf16[98,32], index: 0, kind: input, shape index: {}]   ;;  %s457_s1 = inlined_call_operand.vmem [shape: f32[2,32], index: 1, kind: input, shape index: {}]   ;;  %s458_s2 = inlined_call_operand.vmem [shape: bf16[98,32], index: 2, kind: output, shape index: {}]  }
   0x1   :  { %v312_v0 = vld [vmem:[%s456_s0] sm:$0xff]   ;;  %v343_v4 = vld [vmem:[%s456_s0 + $0x8] sm:$0xff]   ;;  %v344_v5 = vld [vmem:[%s456_s0 + $0x10] sm:$0xff]  }
   0x2   :  { %v371_v1 = vld [vmem:[%s457_s1] ss:$0 sm:$0xff]  ;;  %v313_v2 = vunpack.c.l.bf16 %v312_v0  ;;  %v314_v3 = vunpack.c.h.bf16 %v312_v0  ;;  %v345_v6 = vld [vmem:[%s456_s0 + $0x18] sm:$0xff]   ;;  %v385_v7 = vld [vmem:[%s457_s1 + $0x1] ss:$0 sm:$0xff]  ;;  %v317_v8 = vunpack.c.l.bf16 %v343_v4  ;;  %v318_v9 = vunpack.c.h.bf16 %v343_v4 }
   0x3   :  { %v321_v10 = vunpack.c.l.bf16 %v344_v5  ;;  %v322_v11 = vunpack.c.h.bf16 %v344_v5  ;;  %v325_v14 = vunpack.c.l.bf16 %v345_v6  ;;  %v326_v15 = vunpack.c.h.bf16 %v345_v6  ;;  %v346_v36 = vld [vmem:[%s456_s0 + $0x20] sm:$0xff]   ;;  %v347_v41 = vld [vmem:[%s456_s0 + $0x28] sm:$0xff]   ;;  %v348_v42 = vld [vmem:[%s456_s0 + $0x30] sm:$0xff]  }
   0x4   :  { %v48_v12 = vmul.f32 %v313_v2, %v371_v1  ;;  %v49_v13 = vmul.f32 %v314_v3, %v371_v1  ;;  %v50_v16 = vmul.f32 %v317_v8, %v371_v1  ;;  %v51_v17 = vmul.f32 %v318_v9, %v371_v1 }
   0x5   :  { %v52_v18 = vmul.f32 %v321_v10, %v371_v1  ;;  %v53_v19 = vmul.f32 %v322_v11, %v371_v1  ;;  %v54_v22 = vmul.f32 %v325_v14, %v371_v1  ;;  %v55_v23 = vmul.f32 %v326_v15, %v371_v1 }
   0x6   :  { %v69_v20 = vadd.f32 %v385_v7, %v48_v12  ;;  %v70_v21 = vadd.f32 %v385_v7, %v49_v13  ;;  %v71_v24 = vadd.f32 %v385_v7, %v50_v16  ;;  %v72_v25 = vadd.f32 %v385_v7, %v51_v17 }
   0x7   :  { %v73_v26 = vadd.f32 %v385_v7, %v52_v18  ;;  %v74_v27 = vadd.f32 %v385_v7, %v53_v19  ;;  %v75_v30 = vadd.f32 %v385_v7, %v54_v22  ;;  %v76_v31 = vadd.f32 %v385_v7, %v55_v23 }
   0x8   :  { %v85_v28 = vmax.f32 %v69_v20, 0.0  ;;  %v86_v29 = vmax.f32 %v70_v21, 0.0  ;;  %v87_v32 = vmax.f32 %v71_v24, 0.0  ;;  %v88_v33 = vmax.f32 %v72_v25, 0.0 }
   0x9   :  { %v89_v34 = vmax.f32 %v73_v26, 0.0  ;;  %v90_v35 = vmax.f32 %v74_v27, 0.0  ;;  %v91_v39 = vmax.f32 %v75_v30, 0.0  ;;  %v92_v40 = vmax.f32 %v76_v31, 0.0 }
   0xa   :  { %v295_v37 = vpack.c.bf16 %v85_v28, %v85_v28  ;;  %v296_v38 = vpack.c.bf16 %v86_v29, %v86_v29  ;;  %v297_v43 = vpack.c.bf16 %v87_v32, %v87_v32  ;;  %v298_v44 = vpack.c.bf16 %v88_v33, %v88_v33 }
   0xb   :  { %v299_v45 = vpack.c.bf16 %v89_v34, %v89_v34  ;;  %v300_v46 = vpack.c.bf16 %v90_v35, %v90_v35  ;;  %v301_v47 = vpack.c.bf16 %v91_v39, %v91_v39  ;;  %v302_v48 = vpack.c.bf16 %v92_v40, %v92_v40 }
   0xc   :  { %166 = vst.msk [vmem:[#allocation2] sm:$0xf] %vm165_vm0, %v295_v37  ;;  %167 = vst.msk [vmem:[#allocation2 + $0x4] sm:$0xf] %vm165_vm0, %v296_v38  ;;  %v329_v49 = vunpack.c.l.bf16 %v346_v36  ;;  %v330_v50 = vunpack.c.h.bf16 %v346_v36  ;;  %v333_v51 = vunpack.c.l.bf16 %v347_v41  ;;  %v334_v52 = vunpack.c.h.bf16 %v347_v41 }
   0xd   :  { %168 = vst.msk [vmem:[#allocation2 + $0x8] sm:$0xf] %vm165_vm0, %v297_v43  ;;  %169 = vst.msk [vmem:[#allocation2 + $0xc] sm:$0xf] %vm165_vm0, %v298_v44  ;;  %v337_v53 = vunpack.c.l.bf16 %v348_v42 }
   0xe   :  { %170 = vst.msk [vmem:[#allocation2 + $0x10] sm:$0xf] %vm165_vm0, %v299_v45  ;;  %171 = vst.msk [vmem:[#allocation2 + $0x14] sm:$0xf] %vm165_vm0, %v300_v46  ;;  %v56_v54 = vmul.f32 %v329_v49, %v371_v1  ;;  %v57_v55 = vmul.f32 %v330_v50, %v371_v1  ;;  %v58_v56 = vmul.f32 %v333_v51, %v371_v1 }
   0xf   :  { %172 = vst.msk [vmem:[#allocation2 + $0x18] sm:$0xf] %vm165_vm0, %v301_v47  ;;  %173 = vst.msk [vmem:[#allocation2 + $0x1c] sm:$0xf] %vm165_vm0, %v302_v48  ;;  %v59_v57 = vmul.f32 %v334_v52, %v371_v1  ;;  %v60_v58 = vmul.f32 %v337_v53, %v371_v1 }
  0x10   :  { %v77_v59 = vadd.f32 %v385_v7, %v56_v54  ;;  %v78_v60 = vadd.f32 %v385_v7, %v57_v55  ;;  %v79_v61 = vadd.f32 %v385_v7, %v58_v56 }
  0x11   :  { %v80_v62 = vadd.f32 %v385_v7, %v59_v57  ;;  %v81_v63 = vadd.f32 %v385_v7, %v60_v58 }
  0x12   :  { %v93_v0 = vmax.f32 %v77_v59, 0.0  ;;  %v94_v2 = vmax.f32 %v78_v60, 0.0  ;;  %v95_v3 = vmax.f32 %v79_v61, 0.0 }
  0x13   :  { %v96_v4 = vmax.f32 %v80_v62, 0.0  ;;  %v97_v5 = vmax.f32 %v81_v63, 0.0  ;;  %v199_v6 = vld [vmem:[#allocation2] sm:$0xff]  }
  0x14   :  { %v303_v8 = vpack.c.bf16 %v93_v0, %v93_v0  ;;  %v304_v9 = vpack.c.bf16 %v94_v2, %v94_v2  ;;  %200 = vst [vmem:[%s458_s2] sm:$0xff] %v199_v6   ;;  %v203_v1 = vld [vmem:[#allocation2 + $0x8] sm:$0xff]   ;;  %v305_v11 = vpack.c.bf16 %v95_v3, %v95_v3 }
  0x15   :  { %v207_v10 = vld [vmem:[#allocation2 + $0x10] sm:$0xff]   ;;  %v306_v12 = vpack.c.bf16 %v96_v4, %v96_v4  ;;  %v307_v13 = vpack.c.bf16 %v97_v5, %v97_v5  ;;  %204 = vst [vmem:[%s458_s2 + $0x8] sm:$0xff] %v203_v1  }
  0x16   :  { %208 = vst [vmem:[%s458_s2 + $0x10] sm:$0xff] %v207_v10   ;;  %v211_v7 = vld [vmem:[#allocation2 + $0x18] sm:$0xff]   ;;  %174 = vst.msk [vmem:[#allocation2 + $0x20] sm:$0xf] %vm165_vm0, %v303_v8 }
  0x17   :  { %175 = vst.msk [vmem:[#allocation2 + $0x24] sm:$0xf] %vm165_vm0, %v304_v9  ;;  %212 = vst [vmem:[%s458_s2 + $0x18] sm:$0xff] %v211_v7  }
  0x18   :  { %176 = vst.msk [vmem:[#allocation2 + $0x28] sm:$0xf] %vm165_vm0, %v305_v11  ;;  %177 = vst.msk [vmem:[#allocation2 + $0x2c] sm:$0xf] %vm165_vm0, %v306_v12 }
  0x19   :  { %178 = vst.msk [vmem:[#allocation2 + $0x30] sm:$0xf] %vm165_vm0, %v307_v13 }
  0x1e   :  { %v215_v14 = vld [vmem:[#allocation2 + $0x20] sm:$0xff]  }
  0x1f   :  { %216 = vst [vmem:[%s458_s2 + $0x20] sm:$0xff] %v215_v14   ;;  %v219_v15 = vld [vmem:[#allocation2 + $0x28] sm:$0xff]  }
  0x20   :  { %v223_v16 = vld [vmem:[#allocation2 + $0x30] sm:$0xf]  ;;  %220 = vst [vmem:[%s458_s2 + $0x28] sm:$0xff] %v219_v15  }
  0x21   :  { %224 = vst [vmem:[%s458_s2 + $0x30] sm:$0xf] %v223_v16 }

// kernel: cnn_feature_extractor.6
= control target key start
LH: loop header
LB: loop body
LE: loop exit
PB: predicated region body
PF: predicated region fallthrough
CT: control target
= control target key end

     0   :  { %vm399_vm0 = vcmask 257024   ;;  %vm500_vm1 = vcmask 261120   ;;  %vm538_vm3 = vcmask 253952   ;;  %s1111_s0 = inlined_call_operand.vmem [shape: bf16[98,256], index: 0, kind: input, shape index: {}]   ;;  %s1112_s1 = inlined_call_operand.vmem [shape: bf16[256,32], index: 1, kind: input, shape index: {}]   ;;  %s1113_s2 = inlined_call_operand.vmem [shape: bf16[98,32], index: 2, kind: output, shape index: {0}]   ;;  %s1114_s3 = inlined_call_operand.vmem [shape: f32[1,2,32], index: 3, kind: output, shape index: {1}]  }
   0x1   :  { %v837_v0 = vld [vmem:[%s1112_s1 + $0x40] sm:$0xff]   ;;  %v839_v2 = vld [vmem:[%s1112_s1 + $0x48] sm:$0xff]   ;;  %v841_v4 = vld [vmem:[%s1112_s1 + $0x50] sm:$0xff]  }
   0x2   :  { %v838_v1 = vld [vmem:[%s1112_s1] sm:$0xff]   ;;  %757 = vmatprep.subr.bf16.mxu0 %v837_v0  ;;  %821 = vmatprep.subr.bf16.mxu1 %v837_v0  ;;  %v840_v3 = vld [vmem:[%s1112_s1 + $0x8] sm:$0xff]   ;;  %v842_v5 = vld [vmem:[%s1112_s1 + $0x10] sm:$0xff]  }
   0x3   :  { %758 = vmatpush3.bf16.msra.mxu0 %v838_v1  ;;  %829 = vmatpush3.bf16.msra.mxu1 %v838_v1  ;;  %v843_v6 = vld [vmem:[%s1112_s1 + $0x58] sm:$0xff]   ;;  %v845_v8 = vld [vmem:[%s1112_s1 + $0x60] sm:$0xff]   ;;  %v847_v10 = vld [vmem:[%s1112_s1 + $0x68] sm:$0xff]  }
   0x4   :  { %759 = vmatprep.subr.bf16.mxu0 %v839_v2  ;;  %822 = vmatprep.subr.bf16.mxu1 %v839_v2  ;;  %v844_v7 = vld [vmem:[%s1112_s1 + $0x18] sm:$0xff]   ;;  %v846_v9 = vld [vmem:[%s1112_s1 + $0x20] sm:$0xff]   ;;  %v848_v12 = vld [vmem:[%s1112_s1 + $0x28] sm:$0xff]  }
   0x5   :  { %v855_v11 = vld [vmem:[%s1111_s0 + $0x4] ss:$8 sps:$4 sm:$0xff]   ;;  %v849_v13 = vld [vmem:[%s1112_s1 + $0x70] sm:$0xff]   ;;  %v851_v16 = vld [vmem:[%s1112_s1 + $0x78] sm:$0xff]  }
   0x6   :  { %270 = vmatprep.mubr.bf16.mxu0 %v855_v11  ;;  %v863_v14 = vld [vmem:[%s1111_s0 + $0x44] ss:$8 sps:$4 sm:$0xff]   ;;  %v850_v15 = vld [vmem:[%s1112_s1 + $0x30] sm:$0xff]   ;;  %v852_v17 = vld [vmem:[%s1112_s1 + $0x38] sm:$0xff]  }
   0x7   :  { %760 = vmatpush3.bf16.msra.mxu0 %v840_v3  ;;  %830 = vmatpush3.bf16.msra.mxu1 %v840_v3  ;;  %v853_v18 = vld [vmem:[%s1111_s0] ss:$8 sps:$4 sm:$0xff]   ;;  %v856_v19 = vld [vmem:[%s1111_s0 + $0x14] ss:$8 sps:$4 sm:$0xff]   ;;  %v858_v22 = vld [vmem:[%s1111_s0 + $0x10] ss:$8 sps:$4 sm:$0xff]  }
   0x8   :  { %761 = vmatprep.subr.bf16.mxu0 %v841_v4  ;;  %823 = vmatprep.subr.bf16.mxu1 %v841_v4  ;;  %v861_v20 = vld [vmem:[%s1111_s0 + $0x40] ss:$8 sps:$4 sm:$0xff]   ;;  %v867_v21 = vld [vmem:[%s1111_s0 + $0x54] ss:$8 sps:$4 sm:$0xff]   ;;  %v859_v23 = vld [vmem:[%s1111_s0 + $0x24] ss:$8 sps:$4 sm:$0xff]  }
   0x9   :  { %302 = vmatprep.mubr.bf16.mxu1 %v863_v14  ;;  %v870_v24 = vld [vmem:[%s1111_s0 + $0x50] ss:$8 sps:$4 sm:$0xff]   ;;  %v871_v25 = vld [vmem:[%s1111_s0 + $0x64] ss:$8 sps:$4 sm:$0xff]   ;;  %v864_v26 = vld [vmem:[%s1111_s0 + $0x20] ss:$8 sps:$4 sm:$0xff]  }
   0xa   :  { %v865_v27 = vld [vmem:[%s1111_s0 + $0x34] ss:$8 sps:$4 sm:$0xff]   ;;  %v873_v28 = vld [vmem:[%s1111_s0 + $0x60] ss:$8 sps:$4 sm:$0xff]   ;;  %v869_v30 = vld [vmem:[%s1111_s0 + $0x30] ss:$8 sps:$4 sm:$0xff]  }
   0xb   :  { %762 = vmatpush3.bf16.msra.mxu0 %v842_v5  ;;  %831 = vmatpush3.bf16.msra.mxu1 %v842_v5  ;;  %v874_v29 = vld [vmem:[%s1111_s0 + $0x74] ss:$8 sps:$4 sm:$0xff]   ;;  %v876_v31 = vld [vmem:[%s1111_s0 + $0x70] ss:$8 sps:$4 sm:$0xff]  }
   0xc   :  { %763 = vmatprep.subr.bf16.mxu0 %v843_v6  ;;  %824 = vmatprep.subr.bf16.mxu1 %v843_v6 }
   0xf   :  { %764 = vmatpush3.bf16.msra.mxu0 %v844_v7  ;;  %832 = vmatpush3.bf16.msra.mxu1 %v844_v7 }
  0x10   :  { %765 = vmatprep.subr.bf16.mxu0 %v845_v8  ;;  %825 = vmatprep.subr.bf16.mxu1 %v845_v8 }
  0x13   :  { %766 = vmatpush3.bf16.msra.mxu0 %v846_v9  ;;  %833 = vmatpush3.bf16.msra.mxu1 %v846_v9 }
  0x14   :  { %767 = vmatprep.subr.bf16.mxu0 %v847_v10  ;;  %826 = vmatprep.subr.bf16.mxu1 %v847_v10 }
  0x17   :  { %768 = vmatpush3.bf16.msra.mxu0 %v848_v12  ;;  %834 = vmatpush3.bf16.msra.mxu1 %v848_v12 }
  0x18   :  { %769 = vmatprep.subr.bf16.mxu0 %v849_v13  ;;  %827 = vmatprep.subr.bf16.mxu1 %v849_v13 }
  0x1b   :  { %770 = vmatpush3.bf16.msra.mxu0 %v850_v15  ;;  %835 = vmatpush3.bf16.msra.mxu1 %v850_v15 }
  0x1c   :  { %771 = vmatprep.subr.bf16.mxu0 %v851_v16  ;;  %828 = vmatprep.subr.bf16.mxu1 %v851_v16 }
  0x1f   :  { %772 = vmatpush3.bf16.msra.mxu0 %v852_v17  ;;  %836 = vmatpush3.bf16.msra.mxu1 %v852_v17 }
  0x22   :  { %271 = vmatmul.mubr.bf16.vlgmr.msra.gmra.mrb[0].mxu0 %v853_v18  ;;  %303 = vmatmul.mubr.bf16.vlgmr.msra.gmra.mrb[0].mxu1 %v861_v20  ;;  %v416_v18 = vlaneseq }
  0x23   :  { %278 = vmatprep.mubr.bf16.mxu0 %v856_v19  ;;  %310 = vmatprep.mubr.bf16.mxu1 %v867_v21 }
  0x2a   :  { %279 = vmatmul.mubr.bf16.gmra.mrb[4].mxu0 %v858_v22  ;;  %311 = vmatmul.mubr.bf16.gmra.mrb[4].mxu1 %v870_v24 }
  0x2b   :  { %286 = vmatprep.mubr.bf16.mxu0 %v859_v23  ;;  %318 = vmatprep.mubr.bf16.mxu1 %v871_v25 }
  0x32   :  { %287 = vmatmul.mubr.bf16.gmra.mrb[8].mxu0 %v864_v26  ;;  %319 = vmatmul.mubr.bf16.gmra.mrb[8].mxu1 %v873_v28 }
  0x33   :  { %294 = vmatprep.mubr.bf16.mxu0 %v865_v27  ;;  %326 = vmatprep.mubr.bf16.mxu1 %v874_v29 }
  0x3a   :  { %295 = vmatmul.mubr.bf16.gmra.mrb[12].mxu0 %v869_v30  ;;  %327 = vmatmul.mubr.bf16.gmra.mrb[12].mxu1 %v876_v31  ;;  %v417_v31 = vshrl.u32 %v416_v18, 7 }
  0xf5   :  { %v773_v32 = vpop.f32.mrb[0].mxu0  ;;  %v797_v34 = vpop.f32.mrb[0].mxu1 }
  0xf6   :  { %v774_v33 = vpop.f32.mrb[1].mxu0  ;;  %v798_v37 = vpop.f32.mrb[1].mxu1 }
  0xf7   :  { %v775_v35 = vadd.f32 %v774_v33, %v773_v32  ;;  %v776_v36 = vpop.f32.mrb[2].mxu0  ;;  %v993_v39 = vadd.f32 %v798_v37, %v797_v34  ;;  %v800_v40 = vpop.f32.mrb[2].mxu1 }
  0xf8   :  { %v777_v38 = vpop.f32.mrb[3].mxu0  ;;  %v801_v44 = vpop.f32.mrb[3].mxu1 }
  0xf9   :  { %v741_v41 = vpack.c.bf16 %v775_v35, %v775_v35  ;;  %v540_v42 = vmul.f32 %v775_v35, %v775_v35  ;;  %v778_v43 = vadd.f32 %v777_v38, %v776_v36  ;;  %v749_v45 = vpack.c.bf16 %v993_v39, %v993_v39 }
  0xfa   :  { %v997_v46 = vadd.f32 %v801_v44, %v800_v40  ;;  %v501_v47 = vsel %vm500_vm1, %v775_v35, 0.0 }
  0xfb   :  { %400 = vst.msk [vmem:[#allocation2] sm:$0xf] %vm399_vm0, %v741_v41  ;;  %v742_v48 = vpack.c.bf16 %v778_v43, %v778_v43  ;;  %v502_v49 = vsel %vm500_vm1, %v778_v43, 0.0  ;;  %v541_v50 = vmul.f32 %v778_v43, %v778_v43  ;;  %408 = vst.msk [vmem:[#allocation2 + $0x20] sm:$0xf] %vm399_vm0, %v749_v45  ;;  %v556_v53 = vsel %vm500_vm1, %v540_v42, 0.0 }
  0xfc   :  { %v503_v51 = vadd.f32 %v502_v49, %v501_v47  ;;  %v750_v52 = vpack.c.bf16 %v997_v46, %v997_v46  ;;  %v549_v18 = vmul.f32 %v997_v46, %v997_v46 }
  0xfd   :  { %401 = vst.msk [vmem:[#allocation2 + $0x4] sm:$0xf] %vm399_vm0, %v742_v48  ;;  %v557_v54 = vsel %vm500_vm1, %v541_v50, 0.0  ;;  %v779_v55 = vpop.f32.mrb[4].mxu0  ;;  %v803_v58 = vpop.f32.mrb[4].mxu1 }
  0xfe   :  { %v558_v56 = vadd.f32 %v557_v54, %v556_v53  ;;  %v780_v57 = vpop.f32.mrb[5].mxu0  ;;  %409 = vst.msk [vmem:[#allocation2 + $0x24] sm:$0xf] %vm399_vm0, %v750_v52  ;;  %v804_v61 = vpop.f32.mrb[5].mxu1 }
  0xff   :  { %v781_v59 = vadd.f32 %v780_v57, %v779_v55  ;;  %v782_v60 = vpop.f32.mrb[6].mxu0  ;;  %v1009_v63 = vadd.f32 %v804_v61, %v803_v58  ;;  %v806_v0 = vpop.f32.mrb[6].mxu1 }
 0x100   :  { %v783_v62 = vpop.f32.mrb[7].mxu0  ;;  %v807_v5 = vpop.f32.mrb[7].mxu1 }
 0x101   :  { %v743_v1 = vpack.c.bf16 %v781_v59, %v781_v59  ;;  %v504_v2 = vsel %vm500_vm1, %v781_v59, 0.0  ;;  %v542_v3 = vmul.f32 %v781_v59, %v781_v59  ;;  %v784_v4 = vadd.f32 %v783_v62, %v782_v60 }
 0x102   :  { %v611_v6 = vld [vmem:[#allocation2] sm:$0xf]  ;;  %v505_v7 = vadd.f32 %v504_v2, %v503_v51  ;;  %v751_v8 = vpack.c.bf16 %v1009_v63, %v1009_v63  ;;  %v1024_v17 = vadd.f32 %v807_v5, %v806_v0  ;;  %v429_v51 = vadd.s32 96, %v417_v31 }
 0x103   :  { %612 = vst [vmem:[%s1113_s2] sm:$0xf] %v611_v6  ;;  %402 = vst.msk [vmem:[#allocation2 + $0x8] sm:$0xf] %vm399_vm0, %v743_v1  ;;  %v559_v9 = vsel %vm500_vm1, %v542_v3, 0.0  ;;  %v744_v10 = vpack.c.bf16 %v784_v4, %v784_v4  ;;  %v506_v11 = vsel %vm500_vm1, %v784_v4, 0.0  ;;  %v543_v12 = vmul.f32 %v784_v4, %v784_v4 }
 0x104   :  { %v627_v13 = vld [vmem:[#allocation2 + $0x20] sm:$0xf]  ;;  %v613_v14 = vld [vmem:[#allocation2 + $0x4] sm:$0xf]  ;;  %v560_v15 = vadd.f32 %v559_v9, %v558_v56  ;;  %v507_v16 = vadd.f32 %v506_v11, %v505_v7  ;;  %410 = vst.msk [vmem:[#allocation2 + $0x28] sm:$0xf] %vm399_vm0, %v751_v8  ;;  %v752_v24 = vpack.c.bf16 %v1024_v17, %v1024_v17  ;;  %v548_v6 = vmul.f32 %v993_v39, %v993_v39 }
 0x105   :  { %628 = vst [vmem:[%s1113_s2 + $0x20] sm:$0xf] %v627_v13  ;;  %614 = vst [vmem:[%s1113_s2 + $0x4] sm:$0xf] %v613_v14  ;;  %v561_v19 = vsel %vm500_vm1, %v543_v12, 0.0  ;;  %v785_v20 = vpop.f32.mrb[8].mxu0 }
 0x106   :  { %403 = vst.msk [vmem:[#allocation2 + $0xc] sm:$0xf] %vm399_vm0, %v744_v10  ;;  %v629_v21 = vld [vmem:[#allocation2 + $0x24] sm:$0xf]  ;;  %v562_v22 = vadd.f32 %v561_v19, %v560_v15  ;;  %v786_v23 = vpop.f32.mrb[9].mxu0  ;;  %v809_v25 = vpop.f32.mrb[8].mxu1 }
 0x107   :  { %630 = vst [vmem:[%s1113_s2 + $0x24] sm:$0xf] %v629_v21  ;;  %v787_v26 = vadd.f32 %v786_v23, %v785_v20  ;;  %v788_v27 = vpop.f32.mrb[10].mxu0  ;;  %v810_v28 = vpop.f32.mrb[9].mxu1  ;;  %411 = vst.msk [vmem:[#allocation2 + $0x2c] sm:$0xf] %vm399_vm0, %v752_v24  ;;  %v550_v24 = vmul.f32 %v1009_v63, %v1009_v63 }
 0x108   :  { %v789_v29 = vpop.f32.mrb[11].mxu0  ;;  %v1037_v30 = vadd.f32 %v810_v28, %v809_v25  ;;  %v812_v32 = vpop.f32.mrb[10].mxu1  ;;  %vm448_vm2 = vcmp.lt.s32.totalorder %v429_v51, 98  ;;  %v571_v23 = vsel %vm500_vm1, %v548_v6, 0.0  ;;  %v520_v28 = vsel %vm500_vm1, %v1009_v63, 0.0 }
 0x109   :  { %v745_v33 = vpack.c.bf16 %v787_v26, %v787_v26  ;;  %v508_v34 = vsel %vm500_vm1, %v787_v26, 0.0  ;;  %v544_v35 = vmul.f32 %v787_v26, %v787_v26  ;;  %v790_v36 = vadd.f32 %v789_v29, %v788_v27  ;;  %v813_v37 = vpop.f32.mrb[11].mxu1 }
 0x10a   :  { %v615_v38 = vld [vmem:[#allocation2 + $0x8] sm:$0xf]  ;;  %v509_v40 = vadd.f32 %v508_v34, %v507_v16  ;;  %v753_v41 = vpack.c.bf16 %v1037_v30, %v1037_v30  ;;  %v516_v16 = vsel %vm500_vm1, %v993_v39, 0.0  ;;  %v518_v39 = vsel %vm500_vm1, %v997_v46, 0.0 }
 0x10b   :  { %616 = vst [vmem:[%s1113_s2 + $0x8] sm:$0xf] %v615_v38  ;;  %404 = vst.msk [vmem:[#allocation2 + $0x10] sm:$0xf] %vm399_vm0, %v745_v33  ;;  %v563_v42 = vsel %vm500_vm1, %v544_v35, 0.0  ;;  %v746_v43 = vpack.c.bf16 %v790_v36, %v790_v36  ;;  %v510_v44 = vsel %vm500_vm1, %v790_v36, 0.0  ;;  %v545_v45 = vmul.f32 %v790_v36, %v790_v36 }
 0x10c   :  { %v631_v47 = vld [vmem:[#allocation2 + $0x28] sm:$0xf]  ;;  %v564_v49 = vadd.f32 %v563_v42, %v562_v22  ;;  %v511_v50 = vadd.f32 %v510_v44, %v509_v40  ;;  %412 = vst.msk [vmem:[#allocation2 + $0x30] sm:$0xf] %vm399_vm0, %v753_v41  ;;  %v496_v22 = vsel %vm448_vm2, %v1037_v30, 0.0  ;;  %v573_v27 = vsel %vm500_vm1, %v549_v18, 0.0 }
 0x10d   :  { %v617_v48 = vld [vmem:[#allocation2 + $0xc] sm:$0xf]  ;;  %632 = vst [vmem:[%s1113_s2 + $0x28] sm:$0xf] %v631_v47  ;;  %405 = vst.msk [vmem:[#allocation2 + $0x14] sm:$0xf] %vm399_vm0, %v746_v43  ;;  %v551_v29 = vmul.f32 %v1024_v17, %v1024_v17  ;;  %v552_v31 = vmul.f32 %v496_v22, %v496_v22 }
 0x10e   :  { %618 = vst [vmem:[%s1113_s2 + $0xc] sm:$0xf] %v617_v48  ;;  %v565_v52 = vsel %vm500_vm1, %v545_v45, 0.0  ;;  %v791_v53 = vpop.f32.mrb[12].mxu0  ;;  %v815_v56 = vpop.f32.mrb[12].mxu1  ;;  %v575_v46 = vsel %vm500_vm1, %v550_v24, 0.0 }
 0x10f   :  { %v566_v54 = vadd.f32 %v565_v52, %v564_v49  ;;  %v792_v55 = vpop.f32.mrb[13].mxu0  ;;  %v633_v59 = vld [vmem:[#allocation2 + $0x2c] sm:$0xf]  ;;  %v816_v60 = vpop.f32.mrb[13].mxu1  ;;  %v522_v34 = vsel %vm500_vm1, %v1024_v17, 0.0  ;;  %v524_v35 = vsel %vm500_vm1, %v496_v22, 0.0 }
 0x110   :  { %v793_v57 = vadd.f32 %v792_v55, %v791_v53  ;;  %v794_v58 = vpop.f32.mrb[14].mxu0  ;;  %634 = vst [vmem:[%s1113_s2 + $0x2c] sm:$0xf] %v633_v59  ;;  %v818_v62 = vpop.f32.mrb[14].mxu1  ;;  %v577_v38 = vsel %vm500_vm1, %v551_v29, 0.0  ;;  %v579_v40 = vsel %vm500_vm1, %v552_v31, 0.0 }
 0x111   :  { %v795_v61 = vpop.f32.mrb[15].mxu0  ;;  %v819_v4 = vpop.f32.mrb[15].mxu1 }
 0x112   :  { %v747_v0 = vpack.c.bf16 %v793_v57, %v793_v57  ;;  %v512_v1 = vsel %vm500_vm1, %v793_v57, 0.0  ;;  %v546_v2 = vmul.f32 %v793_v57, %v793_v57  ;;  %v796_v3 = vadd.f32 %v795_v61, %v794_v58  ;;  %v619_v5 = vld [vmem:[#allocation2 + $0x10] sm:$0xf] }
 0x113   :  { %v513_v7 = vadd.f32 %v512_v1, %v511_v50  ;;  %620 = vst [vmem:[%s1113_s2 + $0x10] sm:$0xf] %v619_v5  ;;  %v635_v12 = vld [vmem:[#allocation2 + $0x30] sm:$0xf] }
 0x114   :  { %406 = vst.msk [vmem:[#allocation2 + $0x18] sm:$0xf] %vm399_vm0, %v747_v0  ;;  %v567_v8 = vsel %vm500_vm1, %v546_v2, 0.0  ;;  %v748_v9 = vpack.c.bf16 %v796_v3, %v796_v3  ;;  %v514_v10 = vsel %vm500_vm1, %v796_v3, 0.0  ;;  %v547_v11 = vmul.f32 %v796_v3, %v796_v3  ;;  %v621_v13 = vld [vmem:[#allocation2 + $0x14] sm:$0xf] }
 0x115   :  { %v568_v14 = vadd.f32 %v567_v8, %v566_v54  ;;  %v515_v15 = vadd.f32 %v514_v10, %v513_v7  ;;  %636 = vst [vmem:[%s1113_s2 + $0x30] sm:$0xf] %v635_v12  ;;  %622 = vst [vmem:[%s1113_s2 + $0x14] sm:$0xf] %v621_v13 }
 0x116   :  { %407 = vst.msk [vmem:[#allocation2 + $0x1c] sm:$0xf] %vm399_vm0, %v748_v9  ;;  %v569_v19 = vsel %vm500_vm1, %v547_v11, 0.0 }
 0x117   :  { %v517_v20 = vadd.f32 %v516_v16, %v515_v15  ;;  %v570_v21 = vadd.f32 %v569_v19, %v568_v14 }
 0x119   :  { %v572_v25 = vadd.f32 %v571_v23, %v570_v21  ;;  %v519_v26 = vadd.f32 %v518_v39, %v517_v20 }
 0x11b   :  { %v623_v30 = vld [vmem:[#allocation2 + $0x18] sm:$0xf]  ;;  %v521_v32 = vadd.f32 %v520_v28, %v519_v26  ;;  %v574_v33 = vadd.f32 %v573_v27, %v572_v25 }
 0x11c   :  { %624 = vst [vmem:[%s1113_s2 + $0x18] sm:$0xf] %v623_v30 }
 0x11d   :  { %v625_v36 = vld [vmem:[#allocation2 + $0x1c] sm:$0xf]  ;;  %v523_v63 = vadd.f32 %v522_v34, %v521_v32  ;;  %v576_v37 = vadd.f32 %v575_v46, %v574_v33 }
 0x11e   :  { %626 = vst [vmem:[%s1113_s2 + $0x1c] sm:$0xf] %v625_v36 }
 0x11f   :  { %v578_v41 = vadd.f32 %v577_v38, %v576_v37  ;;  %v525_v42 = vadd.f32 %v524_v35, %v523_v63 }
 0x121   :  { %v532_v43 = vrot.slane %v525_v42, 4  ;;  %v580_v44 = vadd.f32 %v579_v40, %v578_v41 }
 0x123   :  { %v533_v45 = vadd.f32 %v532_v43, %v525_v42  ;;  %v587_v47 = vrot.slane %v580_v44, 4 }
 0x125   :  { %v534_v17 = vrot.slane %v533_v45, 2  ;;  %v588_v48 = vadd.f32 %v587_v47, %v580_v44 }
 0x127   :  { %v535_v49 = vadd.f32 %v534_v17, %v533_v45  ;;  %v589_v50 = vrot.slane %v588_v48, 2 }
 0x129   :  { %v536_v51 = vrot.slane %v535_v49, 1  ;;  %v590_v52 = vadd.f32 %v589_v50, %v588_v48 }
 0x12b   :  { %v537_v53 = vadd.f32 %v536_v51, %v535_v49  ;;  %v591_v54 = vrot.slane %v590_v52, 1 }
 0x12d   :  { %539 = vst.msk [vmem:[%s1114_s3] sm:$0x1] %vm538_vm3, %v537_v53  ;;  %v592_v55 = vadd.f32 %v591_v54, %v590_v52 }
 0x12f   :  { %593 = vst.msk [vmem:[%s1114_s3 + $0x1] sm:$0x1] %vm538_vm3, %v592_v55 }

// kernel: cnn_feature_extractor.9
= control target key start
LH: loop header
LB: loop body
LE: loop exit
PB: predicated region body
PF: predicated region fallthrough
CT: control target
= control target key end

     0   :  { %vm57_vm0 = vcmask 519168   ;;  %s169_s0 = inlined_call_operand.vmem [shape: bf16[18,64], index: 0, kind: input, shape index: {}]   ;;  %s170_s1 = inlined_call_operand.vmem [shape: f32[2,64], index: 1, kind: input, shape index: {}]   ;;  %s171_s2 = inlined_call_operand.vmem [shape: bf16[18,64], index: 2, kind: output, shape index: {}]  }
   0x1   :  { %v128_v0 = vld [vmem:[%s169_s0] sm:$0xff]   ;;  %v135_v4 = vld [vmem:[%s169_s0 + $0x8] sm:$0xff]  }
   0x2   :  { %v117_v1 = vld [vmem:[%s170_s1] ss:$0 sm:$0xff]  ;;  %v129_v2 = vunpack.c.l.bf16 %v128_v0  ;;  %v130_v3 = vunpack.c.h.bf16 %v128_v0  ;;  %v118_v5 = vld [vmem:[%s170_s1 + $0x1] ss:$0 sm:$0xff]  ;;  %v133_v6 = vunpack.c.l.bf16 %v135_v4 }
   0x4   :  { %v24_v7 = vmul.f32 %v129_v2, %v117_v1  ;;  %v25_v8 = vmul.f32 %v130_v3, %v117_v1  ;;  %v26_v9 = vmul.f32 %v133_v6, %v117_v1 }
   0x6   :  { %v33_v10 = vadd.f32 %v118_v5, %v24_v7  ;;  %v34_v11 = vadd.f32 %v118_v5, %v25_v8  ;;  %v35_v12 = vadd.f32 %v118_v5, %v26_v9 }
   0x8   :  { %v37_v13 = vmax.f32 %v33_v10, 0.0  ;;  %v38_v14 = vmax.f32 %v34_v11, 0.0  ;;  %v39_v15 = vmax.f32 %v35_v12, 0.0 }
   0xa   :  { %v123_v16 = vpack.c.bf16 %v37_v13, %v37_v13  ;;  %v124_v17 = vpack.c.bf16 %v38_v14, %v38_v14  ;;  %v125_v18 = vpack.c.bf16 %v39_v15, %v39_v15 }
   0xc   :  { %58 = vst.msk [vmem:[#allocation2] sm:$0xf] %vm57_vm0, %v123_v16  ;;  %59 = vst.msk [vmem:[#allocation2 + $0x4] sm:$0xf] %vm57_vm0, %v124_v17 }
   0xd   :  { %60 = vst.msk [vmem:[#allocation2 + $0x8] sm:$0xf] %vm57_vm0, %v125_v18 }
  0x13   :  { %v79_v19 = vld [vmem:[#allocation2] sm:$0xff]  }
  0x14   :  { %80 = vst [vmem:[%s171_s2] sm:$0xff] %v79_v19   ;;  %v83_v20 = vld [vmem:[#allocation2 + $0x8] sm:$0xf] }
  0x15   :  { %84 = vst [vmem:[%s171_s2 + $0x8] sm:$0xf] %v83_v20 }

// kernel: cnn_feature_extractor.8
= control target key start
LH: loop header
LB: loop body
LE: loop exit
PB: predicated region body
PF: predicated region fallthrough
CT: control target
= control target key end

     0   :  { %v437_v41 = vlaneseq  ;;  %vm432_vm0 = vcmask 519168   ;;  %vm461_vm1 = vcmask 523264   ;;  %vm475_vm3 = vcmask 516096   ;;  %s866_s0 = inlined_call_operand.vmem [shape: bf16[18,512], index: 0, kind: input, shape index: {}]   ;;  %s867_s1 = inlined_call_operand.vmem [shape: bf16[512,64], index: 1, kind: input, shape index: {}]   ;;  %s868_s2 = inlined_call_operand.vmem [shape: bf16[18,64], index: 2, kind: output, shape index: {0}]   ;;  %s869_s3 = inlined_call_operand.vmem [shape: f32[1,2,64], index: 3, kind: output, shape index: {1}]  }
   0x1   :  { %v658_v0 = vld [vmem:[%s867_s1 + $0x40] sm:$0xff]   ;;  %v662_v4 = vld [vmem:[%s867_s1 + $0x48] sm:$0xff]   ;;  %v666_v8 = vld [vmem:[%s867_s1 + $0x50] sm:$0xff]  }
   0x2   :  { %v659_v1 = vld [vmem:[%s867_s1 + $0xc0] sm:$0xff]   ;;  %602 = vmatprep.subr.bf16.mxu0 %v658_v0  ;;  %v663_v5 = vld [vmem:[%s867_s1 + $0xc8] sm:$0xff]   ;;  %v667_v9 = vld [vmem:[%s867_s1 + $0xd0] sm:$0xff]   ;;  %v438_v52 = vshrl.u32 %v437_v41, 7 }
   0x3   :  { %v660_v2 = vld [vmem:[%s867_s1] sm:$0xff]   ;;  %630 = vmatprep.subr.bf16.mxu1 %v659_v1  ;;  %v664_v6 = vld [vmem:[%s867_s1 + $0x8] sm:$0xff]   ;;  %v668_v10 = vld [vmem:[%s867_s1 + $0x10] sm:$0xff]  }
   0x4   :  { %v661_v3 = vld [vmem:[%s867_s1 + $0x80] sm:$0xff]   ;;  %603 = vmatpush3.bf16.msra.mxu0 %v660_v2  ;;  %v665_v7 = vld [vmem:[%s867_s1 + $0x88] sm:$0xff]   ;;  %v669_v11 = vld [vmem:[%s867_s1 + $0x90] sm:$0xff]   ;;  %v440_v59 = vadd.s32 16, %v438_v52 }
   0x5   :  { %631 = vmatpush3.bf16.msra.mxu1 %v661_v3  ;;  %604 = vmatprep.subr.bf16.mxu0 %v662_v4  ;;  %v670_v12 = vld [vmem:[%s867_s1 + $0x58] sm:$0xff]   ;;  %v674_v16 = vld [vmem:[%s867_s1 + $0x60] sm:$0xff]   ;;  %v678_v20 = vld [vmem:[%s867_s1 + $0x68] sm:$0xff]  }
   0x6   :  { %632 = vmatprep.subr.bf16.mxu1 %v663_v5  ;;  %v671_v13 = vld [vmem:[%s867_s1 + $0xd8] sm:$0xff]   ;;  %v675_v17 = vld [vmem:[%s867_s1 + $0xe0] sm:$0xff]   ;;  %v679_v21 = vld [vmem:[%s867_s1 + $0xe8] sm:$0xff]   ;;  %vm447_vm2 = vcmp.lt.s32.totalorder %v440_v59, 18 }
   0x7   :  { %v672_v14 = vld [vmem:[%s867_s1 + $0x18] sm:$0xff]   ;;  %v676_v18 = vld [vmem:[%s867_s1 + $0x20] sm:$0xff]   ;;  %v680_v22 = vld [vmem:[%s867_s1 + $0x28] sm:$0xff]  }
   0x8   :  { %605 = vmatpush3.bf16.msra.mxu0 %v664_v6  ;;  %v673_v15 = vld [vmem:[%s867_s1 + $0x98] sm:$0xff]   ;;  %v677_v19 = vld [vmem:[%s867_s1 + $0xa0] sm:$0xff]   ;;  %v681_v23 = vld [vmem:[%s867_s1 + $0xa8] sm:$0xff]  }
   0x9   :  { %633 = vmatpush3.bf16.msra.mxu1 %v665_v7  ;;  %606 = vmatprep.subr.bf16.mxu0 %v666_v8  ;;  %v682_v24 = vld [vmem:[%s867_s1 + $0x70] sm:$0xff]   ;;  %v686_v28 = vld [vmem:[%s867_s1 + $0x78] sm:$0xff]  }
   0xa   :  { %634 = vmatprep.subr.bf16.mxu1 %v667_v9  ;;  %v683_v25 = vld [vmem:[%s867_s1 + $0xf0] sm:$0xff]   ;;  %v687_v29 = vld [vmem:[%s867_s1 + $0xf8] sm:$0xff]  }
   0xb   :  { %v684_v26 = vld [vmem:[%s867_s1 + $0x30] sm:$0xff]   ;;  %v688_v30 = vld [vmem:[%s867_s1 + $0x38] sm:$0xff]  }
   0xc   :  { %607 = vmatpush3.bf16.msra.mxu0 %v668_v10  ;;  %v685_v27 = vld [vmem:[%s867_s1 + $0xb0] sm:$0xff]   ;;  %v689_v31 = vld [vmem:[%s867_s1 + $0xb8] sm:$0xff]  }
   0xd   :  { %635 = vmatpush3.bf16.msra.mxu1 %v669_v11  ;;  %608 = vmatprep.subr.bf16.mxu0 %v670_v12  ;;  %v690_v32 = vld [vmem:[%s866_s0] ss:$16 sps:$4 sm:$0xff]   ;;  %v692_v33 = vld [vmem:[%s866_s0 + $0x4] ss:$16 sps:$4 sm:$0xff]   ;;  %v693_v34 = vld [vmem:[%s866_s0 + $0x8] ss:$16 sps:$4 sm:$0xff]  }
   0xe   :  { %636 = vmatprep.subr.bf16.mxu1 %v671_v13  ;;  %v695_v35 = vld [vmem:[%s866_s0 + $0xc] ss:$16 sps:$4 sm:$0xff]   ;;  %350 = vmatprep.mubr.bf16.mxu0 %v692_v33  ;;  %v696_v36 = vld [vmem:[%s866_s0 + $0x24] ss:$16 sps:$4 sm:$0xff]   ;;  %v700_v38 = vld [vmem:[%s866_s0 + $0x20] ss:$16 sps:$4 sm:$0xff]  }
   0xf   :  { %399 = vmatprep.mubr.bf16.mxu1 %v695_v35  ;;  %v698_v37 = vld [vmem:[%s866_s0 + $0x2c] ss:$16 sps:$4 sm:$0xff]   ;;  %v701_v39 = vld [vmem:[%s866_s0 + $0x28] ss:$16 sps:$4 sm:$0xff]  }
  0x10   :  { %609 = vmatpush3.bf16.msra.mxu0 %v672_v14 }
  0x11   :  { %637 = vmatpush3.bf16.msra.mxu1 %v673_v15  ;;  %610 = vmatprep.subr.bf16.mxu0 %v674_v16 }
  0x12   :  { %638 = vmatprep.subr.bf16.mxu1 %v675_v17 }
  0x14   :  { %611 = vmatpush3.bf16.msra.mxu0 %v676_v18 }
  0x15   :  { %639 = vmatpush3.bf16.msra.mxu1 %v677_v19  ;;  %612 = vmatprep.subr.bf16.mxu0 %v678_v20 }
  0x16   :  { %640 = vmatprep.subr.bf16.mxu1 %v679_v21 }
  0x18   :  { %613 = vmatpush3.bf16.msra.mxu0 %v680_v22 }
  0x19   :  { %641 = vmatpush3.bf16.msra.mxu1 %v681_v23  ;;  %614 = vmatprep.subr.bf16.mxu0 %v682_v24 }
  0x1a   :  { %642 = vmatprep.subr.bf16.mxu1 %v683_v25 }
  0x1c   :  { %615 = vmatpush3.bf16.msra.mxu0 %v684_v26 }
  0x1d   :  { %643 = vmatpush3.bf16.msra.mxu1 %v685_v27  ;;  %616 = vmatprep.subr.bf16.mxu0 %v686_v28 }
  0x1e   :  { %644 = vmatprep.subr.bf16.mxu1 %v687_v29 }
  0x20   :  { %617 = vmatpush3.bf16.msra.mxu0 %v688_v30 }
  0x21   :  { %645 = vmatpush3.bf16.msra.mxu1 %v689_v31 }
  0x23   :  { %351 = vmatmul.mubr.bf16.vlgmr.msra.gmra.mrb[0].mxu0 %v690_v32 }
  0x24   :  { %400 = vmatmul.mubr.bf16.vlgmr.msra.gmra.mrb[0].mxu1 %v693_v34  ;;  %358 = vmatprep.mubr.bf16.mxu0 %v696_v36 }
  0x25   :  { %407 = vmatprep.mubr.bf16.mxu1 %v698_v37 }
  0x2b   :  { %359 = vmatmul.mubr.bf16.gmra.mrb[4].mxu0 %v700_v38 }
  0x2c   :  { %408 = vmatmul.mubr.bf16.gmra.mrb[4].mxu1 %v701_v39 }
  0xf6   :  { %v618_v40 = vpop.f32.mrb[0].mxu0 }
  0xf7   :  { %v646_v42 = vpop.f32.mrb[0].mxu1  ;;  %v619_v43 = vpop.f32.mrb[1].mxu0 }
  0xf8   :  { %v620_v44 = vadd.f32 %v619_v43, %v618_v40  ;;  %v647_v45 = vpop.f32.mrb[1].mxu1  ;;  %v621_v46 = vpop.f32.mrb[2].mxu0 }
  0xf9   :  { %v648_v47 = vadd.f32 %v647_v45, %v646_v42  ;;  %v649_v48 = vpop.f32.mrb[2].mxu1  ;;  %v622_v49 = vpop.f32.mrb[3].mxu0 }
  0xfa   :  { %v623_v50 = vadd.f32 %v622_v49, %v621_v46  ;;  %v650_v51 = vpop.f32.mrb[3].mxu1 }
  0xfb   :  { %v402_v53 = vadd.f32 %v648_v47, %v620_v44  ;;  %v651_v54 = vadd.f32 %v650_v51, %v649_v48 }
  0xfd   :  { %v598_v55 = vpack.c.bf16 %v402_v53, %v402_v53  ;;  %v477_v56 = vmul.f32 %v402_v53, %v402_v53  ;;  %v405_v57 = vadd.f32 %v651_v54, %v623_v50  ;;  %v462_v60 = vsel %vm461_vm1, %v402_v53, 0.0 }
  0xfe   :  { %v624_v58 = vpop.f32.mrb[4].mxu0 }
  0xff   :  { %433 = vst.msk [vmem:[#allocation2] sm:$0xf] %vm432_vm0, %v598_v55  ;;  %v599_v61 = vpack.c.bf16 %v405_v57, %v405_v57  ;;  %v463_v62 = vsel %vm461_vm1, %v405_v57, 0.0  ;;  %v478_v63 = vmul.f32 %v405_v57, %v405_v57  ;;  %v652_v0 = vpop.f32.mrb[4].mxu1  ;;  %v625_v1 = vpop.f32.mrb[5].mxu0  ;;  %v481_v6 = vsel %vm461_vm1, %v477_v56, 0.0 }
 0x100   :  { %v464_v2 = vadd.f32 %v463_v62, %v462_v60  ;;  %v626_v3 = vadd.f32 %v625_v1, %v624_v58  ;;  %v653_v4 = vpop.f32.mrb[5].mxu1  ;;  %v627_v5 = vpop.f32.mrb[6].mxu0 }
 0x101   :  { %434 = vst.msk [vmem:[#allocation2 + $0x4] sm:$0xf] %vm432_vm0, %v599_v61  ;;  %v482_v7 = vsel %vm461_vm1, %v478_v63, 0.0  ;;  %v654_v8 = vadd.f32 %v653_v4, %v652_v0  ;;  %v655_v9 = vpop.f32.mrb[6].mxu1  ;;  %v628_v10 = vpop.f32.mrb[7].mxu0 }
 0x102   :  { %v483_v11 = vadd.f32 %v482_v7, %v481_v6  ;;  %v656_v12 = vpop.f32.mrb[7].mxu1 }
 0x103   :  { %v410_v13 = vadd.f32 %v654_v8, %v626_v3 }
 0x105   :  { %v600_v14 = vpack.c.bf16 %v410_v13, %v410_v13  ;;  %v459_v15 = vsel %vm447_vm2, %v410_v13, 0.0 }
 0x106   :  { %v512_v16 = vld [vmem:[#allocation2] sm:$0xf]  ;;  %v465_v17 = vsel %vm461_vm1, %v459_v15, 0.0  ;;  %v479_v18 = vmul.f32 %v459_v15, %v459_v15 }
 0x107   :  { %513 = vst [vmem:[%s868_s2] sm:$0xf] %v512_v16  ;;  %435 = vst.msk [vmem:[#allocation2 + $0x8] sm:$0xf] %vm432_vm0, %v600_v14  ;;  %v466_v19 = vadd.f32 %v465_v17, %v464_v2 }
 0x108   :  { %v514_v20 = vld [vmem:[#allocation2 + $0x4] sm:$0xf]  ;;  %v484_v21 = vsel %vm461_vm1, %v479_v18, 0.0 }
 0x109   :  { %515 = vst [vmem:[%s868_s2 + $0x4] sm:$0xf] %v514_v20  ;;  %v469_v22 = vrot.slane %v466_v19, 4  ;;  %v485_v23 = vadd.f32 %v484_v21, %v483_v11 }
 0x10b   :  { %v470_v24 = vadd.f32 %v469_v22, %v466_v19  ;;  %v488_v25 = vrot.slane %v485_v23, 4 }
 0x10d   :  { %v471_v26 = vrot.slane %v470_v24, 2  ;;  %v489_v27 = vadd.f32 %v488_v25, %v485_v23 }
 0x10e   :  { %v516_v28 = vld [vmem:[#allocation2 + $0x8] sm:$0xf] }
 0x10f   :  { %v472_v29 = vadd.f32 %v471_v26, %v470_v24  ;;  %v490_v30 = vrot.slane %v489_v27, 2  ;;  %517 = vst [vmem:[%s868_s2 + $0x8] sm:$0xf] %v516_v28 }
 0x111   :  { %v473_v31 = vrot.slane %v472_v29, 1  ;;  %v491_v32 = vadd.f32 %v490_v30, %v489_v27 }
 0x113   :  { %v474_v33 = vadd.f32 %v473_v31, %v472_v29  ;;  %v492_v34 = vrot.slane %v491_v32, 1 }
 0x115   :  { %476 = vst.msk [vmem:[%s869_s3] sm:$0x1] %vm475_vm3, %v474_v33  ;;  %v493_v35 = vadd.f32 %v492_v34, %v491_v32 }
 0x117   :  { %494 = vst.msk [vmem:[%s869_s3 + $0x1] sm:$0x1] %vm475_vm3, %v493_v35 }

// kernel: cnn_feature_extractor.11
= control target key start
LH: loop header
LB: loop body
LE: loop exit
PB: predicated region body
PF: predicated region fallthrough
CT: control target
= control target key end

     0   :  { %s140_s0 = inlined_call_operand.vmem [shape: bf16[18,128], index: 0, kind: input, shape index: {}]   ;;  %s141_s1 = inlined_call_operand.vmem [shape: f32[2,128], index: 1, kind: input, shape index: {}]   ;;  %s142_s2 = inlined_call_operand.vmem [shape: f32[18,128], index: 2, kind: output, shape index: {}]  }
   0x1   :  { %v96_v0 = vld [vmem:[%s140_s0] sm:$0xff]   ;;  %v103_v4 = vld [vmem:[%s140_s0 + $0x8] sm:$0xf]  }
   0x2   :  { %v93_v1 = vld [vmem:[%s141_s1] ss:$0 sm:$0xff]  ;;  %v97_v2 = vunpack.c.l.bf16 %v96_v0  ;;  %v98_v3 = vunpack.c.h.bf16 %v96_v0  ;;  %v94_v5 = vld [vmem:[%s141_s1 + $0x1] ss:$0 sm:$0xff]  ;;  %v101_v6 = vunpack.c.l.bf16 %v103_v4 }
   0x4   :  { %v24_v7 = vmul.f32 %v97_v2, %v93_v1  ;;  %v25_v8 = vmul.f32 %v98_v3, %v93_v1  ;;  %v26_v9 = vmul.f32 %v101_v6, %v93_v1 }
   0x6   :  { %v33_v10 = vadd.f32 %v94_v5, %v24_v7  ;;  %v34_v11 = vadd.f32 %v94_v5, %v25_v8  ;;  %v35_v12 = vadd.f32 %v94_v5, %v26_v9 }
   0x8   :  { %v37_v13 = vmax.f32 %v33_v10, 0.0  ;;  %v38_v14 = vmax.f32 %v34_v11, 0.0  ;;  %v39_v15 = vmax.f32 %v35_v12, 0.0 }
   0xa   :  { %79 = vst [vmem:[%s142_s2] sm:$0xff] %v37_v13  ;;  %81 = vst [vmem:[%s142_s2 + $0x8] sm:$0xff] %v38_v14 }
   0xb   :  { %83 = vst [vmem:[%s142_s2 + $0x10] sm:$0xff] %v39_v15 }

// kernel: cnn_feature_extractor.10
= control target key start
LH: loop header
LB: loop body
LE: loop exit
PB: predicated region body
PF: predicated region fallthrough
CT: control target
= control target key end

     0   :  { %vm364_vm0 = vcmask 523264   ;;  %v538_v59 = vlaneseq  ;;  %s1006_s0 = inlined_call_operand.vmem [shape: bf16[18,576], index: 0, kind: input, shape index: {}]   ;;  %s1007_s1 = inlined_call_operand.vmem [shape: bf16[576,128], index: 1, kind: input, shape index: {}]   ;;  %s1008_s2 = inlined_call_operand.vmem [shape: bf16[18,128], index: 2, kind: output, shape index: {0}]   ;;  %s1009_s3 = inlined_call_operand.vmem [shape: f32[1,2,128], index: 3, kind: output, shape index: {1}]  }
   0x1   :  { %v786_v0 = vld [vmem:[%s1007_s1 + $0x40] sm:$0xff]   ;;  %v790_v4 = vld [vmem:[%s1007_s1 + $0x48] sm:$0xff]   ;;  %v794_v8 = vld [vmem:[%s1007_s1 + $0x50] sm:$0xff]  }
   0x2   :  { %v787_v1 = vld [vmem:[%s1007_s1 + $0xc0] sm:$0xff]   ;;  %712 = vmatprep.subr.bf16.mxu0 %v786_v0  ;;  %v791_v5 = vld [vmem:[%s1007_s1 + $0xc8] sm:$0xff]   ;;  %v795_v9 = vld [vmem:[%s1007_s1 + $0xd0] sm:$0xff]  }
   0x3   :  { %v788_v2 = vld [vmem:[%s1007_s1] sm:$0xff]   ;;  %740 = vmatprep.subr.bf16.mxu1 %v787_v1  ;;  %v792_v6 = vld [vmem:[%s1007_s1 + $0x8] sm:$0xff]   ;;  %v796_v10 = vld [vmem:[%s1007_s1 + $0x10] sm:$0xff]  }
   0x4   :  { %v789_v3 = vld [vmem:[%s1007_s1 + $0x80] sm:$0xff]   ;;  %713 = vmatpush3.bf16.msra.mxu0 %v788_v2  ;;  %v793_v7 = vld [vmem:[%s1007_s1 + $0x88] sm:$0xff]   ;;  %v797_v11 = vld [vmem:[%s1007_s1 + $0x90] sm:$0xff]  }
   0x5   :  { %741 = vmatpush3.bf16.msra.mxu1 %v789_v3  ;;  %714 = vmatprep.subr.bf16.mxu0 %v790_v4  ;;  %v798_v12 = vld [vmem:[%s1007_s1 + $0x58] sm:$0xff]   ;;  %v802_v16 = vld [vmem:[%s1007_s1 + $0x60] sm:$0xff]   ;;  %v806_v20 = vld [vmem:[%s1007_s1 + $0x68] sm:$0xff]  }
   0x6   :  { %742 = vmatprep.subr.bf16.mxu1 %v791_v5  ;;  %v799_v13 = vld [vmem:[%s1007_s1 + $0xd8] sm:$0xff]   ;;  %v803_v17 = vld [vmem:[%s1007_s1 + $0xe0] sm:$0xff]   ;;  %v807_v21 = vld [vmem:[%s1007_s1 + $0xe8] sm:$0xff]  }
   0x7   :  { %v800_v14 = vld [vmem:[%s1007_s1 + $0x18] sm:$0xff]   ;;  %v804_v18 = vld [vmem:[%s1007_s1 + $0x20] sm:$0xff]   ;;  %v808_v22 = vld [vmem:[%s1007_s1 + $0x28] sm:$0xff]  }
   0x8   :  { %715 = vmatpush3.bf16.msra.mxu0 %v792_v6  ;;  %v801_v15 = vld [vmem:[%s1007_s1 + $0x98] sm:$0xff]   ;;  %v805_v19 = vld [vmem:[%s1007_s1 + $0xa0] sm:$0xff]   ;;  %v809_v23 = vld [vmem:[%s1007_s1 + $0xa8] sm:$0xff]   ;;  %v539_v6 = vshrl.u32 %v538_v59, 7 }
   0x9   :  { %743 = vmatpush3.bf16.msra.mxu1 %v793_v7  ;;  %716 = vmatprep.subr.bf16.mxu0 %v794_v8  ;;  %v810_v24 = vld [vmem:[%s1007_s1 + $0x70] sm:$0xff]   ;;  %v814_v28 = vld [vmem:[%s1007_s1 + $0x78] sm:$0xff]   ;;  %v823_v35 = vld [vmem:[%s1006_s0 + $0xc] ss:$20 sps:$4 sm:$0xff]  }
   0xa   :  { %744 = vmatprep.subr.bf16.mxu1 %v795_v9  ;;  %v811_v25 = vld [vmem:[%s1007_s1 + $0xf0] sm:$0xff]   ;;  %v815_v29 = vld [vmem:[%s1007_s1 + $0xf8] sm:$0xff]   ;;  %v824_v36 = vld [vmem:[%s1007_s1 + $0x100] sm:$0xff]   ;;  %452 = vmatprep.mubr.bf16.mxu1 %v823_v35 }
   0xb   :  { %v812_v26 = vld [vmem:[%s1007_s1 + $0x30] sm:$0xff]   ;;  %v816_v30 = vld [vmem:[%s1007_s1 + $0x38] sm:$0xff]   ;;  %v825_v37 = vld [vmem:[%s1007_s1 + $0x108] sm:$0xff]  }
   0xc   :  { %717 = vmatpush3.bf16.msra.mxu0 %v796_v10  ;;  %v813_v27 = vld [vmem:[%s1007_s1 + $0xb0] sm:$0xff]   ;;  %v817_v31 = vld [vmem:[%s1007_s1 + $0xb8] sm:$0xff]   ;;  %v826_v38 = vld [vmem:[%s1006_s0 + $0x2c] ss:$20 sps:$4 sm:$0xff]  }
   0xd   :  { %745 = vmatpush3.bf16.msra.mxu1 %v797_v11  ;;  %718 = vmatprep.subr.bf16.mxu0 %v798_v12  ;;  %v818_v32 = vld [vmem:[%s1006_s0] ss:$20 sps:$4 sm:$0xff]   ;;  %v820_v33 = vld [vmem:[%s1006_s0 + $0x4] ss:$20 sps:$4 sm:$0xff]   ;;  %v821_v34 = vld [vmem:[%s1006_s0 + $0x8] ss:$20 sps:$4 sm:$0xff]  }
   0xe   :  { %746 = vmatprep.subr.bf16.mxu1 %v799_v13  ;;  %403 = vmatprep.mubr.bf16.mxu0 %v820_v33  ;;  %v828_v39 = vld [vmem:[%s1006_s0 + $0x34] ss:$20 sps:$4 sm:$0xff]   ;;  %v831_v42 = vld [vmem:[%s1006_s0 + $0x30] ss:$20 sps:$4 sm:$0xff]   ;;  %v833_v44 = vld [vmem:[%s1007_s1 + $0x118] sm:$0xff]   ;;  %v541_v11 = vadd.s32 16, %v539_v6 }
   0xf   :  { %v830_v40 = vld [vmem:[%s1006_s0 + $0x28] ss:$20 sps:$4 sm:$0xff]   ;;  %v832_v41 = vld [vmem:[%s1007_s1 + $0x110] sm:$0xff]   ;;  %v835_v45 = vld [vmem:[%s1006_s0 + $0x38] ss:$20 sps:$4 sm:$0xff]  }
  0x10   :  { %719 = vmatpush3.bf16.msra.mxu0 %v800_v14  ;;  %v834_v43 = vld [vmem:[%s1006_s0 + $0x10] ss:$20 sps:$4 sm:$0xff]   ;;  %vm548_vm1 = vcmp.lt.s32.totalorder %v541_v11, 18 }
  0x11   :  { %747 = vmatpush3.bf16.msra.mxu1 %v801_v15  ;;  %720 = vmatprep.subr.bf16.mxu0 %v802_v16 }
  0x12   :  { %748 = vmatprep.subr.bf16.mxu1 %v803_v17 }
  0x14   :  { %721 = vmatpush3.bf16.msra.mxu0 %v804_v18 }
  0x15   :  { %749 = vmatpush3.bf16.msra.mxu1 %v805_v19  ;;  %722 = vmatprep.subr.bf16.mxu0 %v806_v20 }
  0x16   :  { %750 = vmatprep.subr.bf16.mxu1 %v807_v21 }
  0x18   :  { %723 = vmatpush3.bf16.msra.mxu0 %v808_v22 }
  0x19   :  { %751 = vmatpush3.bf16.msra.mxu1 %v809_v23  ;;  %724 = vmatprep.subr.bf16.mxu0 %v810_v24 }
  0x1a   :  { %752 = vmatprep.subr.bf16.mxu1 %v811_v25 }
  0x1c   :  { %725 = vmatpush3.bf16.msra.mxu0 %v812_v26 }
  0x1d   :  { %753 = vmatpush3.bf16.msra.mxu1 %v813_v27  ;;  %726 = vmatprep.subr.bf16.mxu0 %v814_v28 }
  0x1e   :  { %754 = vmatprep.subr.bf16.mxu1 %v815_v29 }
  0x20   :  { %727 = vmatpush3.bf16.msra.mxu0 %v816_v30 }
  0x21   :  { %755 = vmatpush3.bf16.msra.mxu1 %v817_v31  ;;  %774 = vmatprep.subr.bf16.mxu0 %v824_v36 }
  0x23   :  { %404 = vmatmul.mubr.bf16.vlgmr.msra.gmra.mrb[0].mxu0 %v818_v32 }
  0x24   :  { %453 = vmatmul.mubr.bf16.vlgmr.msra.gmra.mrb[0].mxu1 %v821_v34  ;;  %775 = vmatpush3.bf16.msra.mxu0 %v824_v36 }
  0x25   :  { %776 = vmatprep.subr.bf16.mxu0 %v825_v37  ;;  %411 = vmatprep.mubr.bf16.mxu0 %v826_v38 }
  0x26   :  { %460 = vmatprep.mubr.bf16.mxu1 %v828_v39 }
  0x28   :  { %777 = vmatpush3.bf16.msra.mxu0 %v825_v37 }
  0x29   :  { %778 = vmatprep.subr.bf16.mxu0 %v832_v41 }
  0x2b   :  { %412 = vmatmul.mubr.bf16.gmra.mrb[4].mxu0 %v830_v40 }
  0x2c   :  { %461 = vmatmul.mubr.bf16.gmra.mrb[4].mxu1 %v831_v42  ;;  %782 = vmatprep.mubr.msk.bf16.mxu0 %vm364_vm0, %v834_v43 }
  0x2d   :  { %779 = vmatpush3.bf16.msra.mxu0 %v832_v41 }
  0x2e   :  { %780 = vmatprep.subr.bf16.mxu0 %v833_v44 }
  0x31   :  { %781 = vmatpush3.bf16.msra.mxu0 %v833_v44 }
  0x34   :  { %783 = vmatmul.mubr.msk.bf16.vlgmr.msra.gmra.mrb[8].mxu0 %vm364_vm0, %v835_v45 }
  0xf6   :  { %v728_v46 = vpop.f32.mrb[0].mxu0 }
  0xf7   :  { %v756_v47 = vpop.f32.mrb[0].mxu1  ;;  %v729_v48 = vpop.f32.mrb[1].mxu0 }
  0xf8   :  { %v730_v49 = vadd.f32 %v729_v48, %v728_v46  ;;  %v757_v50 = vpop.f32.mrb[1].mxu1  ;;  %v731_v51 = vpop.f32.mrb[2].mxu0 }
  0xf9   :  { %v758_v52 = vadd.f32 %v757_v50, %v756_v47  ;;  %v759_v53 = vpop.f32.mrb[2].mxu1  ;;  %v732_v54 = vpop.f32.mrb[3].mxu0 }
  0xfa   :  { %v733_v55 = vadd.f32 %v732_v54, %v731_v51  ;;  %v760_v56 = vpop.f32.mrb[3].mxu1 }
  0xfb   :  { %v761_v57 = vadd.f32 %v760_v56, %v759_v53  ;;  %v455_v58 = vadd.f32 %v758_v52, %v730_v49 }
  0xfd   :  { %v458_v60 = vadd.f32 %v761_v57, %v733_v55 }
  0xfe   :  { %v734_v61 = vpop.f32.mrb[4].mxu0 }
  0xff   :  { %v762_v62 = vpop.f32.mrb[4].mxu1  ;;  %v735_v63 = vpop.f32.mrb[5].mxu0 }
 0x100   :  { %v736_v0 = vadd.f32 %v735_v63, %v734_v61  ;;  %v763_v1 = vpop.f32.mrb[5].mxu1  ;;  %v737_v2 = vpop.f32.mrb[6].mxu0 }
 0x101   :  { %v764_v3 = vadd.f32 %v763_v1, %v762_v62  ;;  %v765_v4 = vpop.f32.mrb[6].mxu1  ;;  %v738_v5 = vpop.f32.mrb[7].mxu0 }
 0x102   :  { %v739_v7 = vadd.f32 %v738_v5, %v737_v2  ;;  %v766_v8 = vpop.f32.mrb[7].mxu1 }
 0x103   :  { %v767_v9 = vadd.f32 %v766_v8, %v765_v4  ;;  %v463_v10 = vadd.f32 %v764_v3, %v736_v0 }
 0x105   :  { %v466_v12 = vadd.f32 %v767_v9, %v739_v7 }
 0x107   :  { %v784_v13 = vpop.f32.mrb[8].mxu0 }
 0x108   :  { %v512_v14 = vadd.f32 %v784_v13, %v463_v10  ;;  %v503_v15 = vpop.f32.mrb[9].mxu0 }
 0x109   :  { %v504_v16 = vadd.f32 %v503_v15, %v455_v58  ;;  %v785_v17 = vpop.f32.mrb[10].mxu0 }
 0x10a   :  { %v515_v18 = vadd.f32 %v785_v17, %v466_v12  ;;  %v506_v19 = vpop.f32.mrb[11].mxu0  ;;  %v560_v21 = vsel %vm548_vm1, %v512_v14, 0.0 }
 0x10b   :  { %v507_v20 = vadd.f32 %v506_v19, %v458_v60  ;;  %v572_v23 = vmul.f32 %v504_v16, %v504_v16  ;;  %v574_v27 = vmul.f32 %v560_v21, %v560_v21 }
 0x10c   :  { %v709_v22 = vpack.c.bf16 %v515_v18, %v512_v14 }
 0x10d   :  { %v704_v24 = vpack.c.bf16 %v507_v20, %v504_v16  ;;  %v562_v25 = vadd.f32 %v507_v20, %v504_v16  ;;  %v573_v26 = vmul.f32 %v507_v20, %v507_v20 }
 0x10e   :  { %711 = vst [vmem:[#allocation2 + $0x8] sm:$0xff] %v709_v22  }
 0x10f   :  { %705 = vst [vmem:[#allocation2] sm:$0xff] %v704_v24   ;;  %v563_v28 = vadd.f32 %v562_v25, %v560_v21  ;;  %v576_v29 = vadd.f32 %v573_v26, %v572_v23 }
 0x111   :  { %v565_v30 = vrot.slane %v563_v28, 4  ;;  %v577_v31 = vadd.f32 %v576_v29, %v574_v27 }
 0x113   :  { %v566_v32 = vadd.f32 %v565_v30, %v563_v28  ;;  %v579_v33 = vrot.slane %v577_v31, 4 }
 0x115   :  { %v607_v34 = vld [vmem:[#allocation2 + $0x8] sm:$0xf]  ;;  %v567_v35 = vrot.slane %v566_v32, 2  ;;  %v580_v36 = vadd.f32 %v579_v33, %v577_v31 }
 0x116   :  { %608 = vst [vmem:[%s1008_s2 + $0x8] sm:$0xf] %v607_v34  ;;  %v603_v37 = vld [vmem:[#allocation2] sm:$0xff]  }
 0x117   :  { %v568_v38 = vadd.f32 %v567_v35, %v566_v32  ;;  %v581_v39 = vrot.slane %v580_v36, 2  ;;  %604 = vst [vmem:[%s1008_s2] sm:$0xff] %v603_v37  }
 0x119   :  { %v569_v40 = vrot.slane %v568_v38, 1  ;;  %v582_v41 = vadd.f32 %v581_v39, %v580_v36 }
 0x11b   :  { %v570_v42 = vadd.f32 %v569_v40, %v568_v38  ;;  %v583_v43 = vrot.slane %v582_v41, 1 }
 0x11d   :  { %571 = vst [vmem:[%s1009_s3] sm:$0x1] %v570_v42  ;;  %v584_v44 = vadd.f32 %v583_v43, %v582_v41 }
 0x11f   :  { %585 = vst [vmem:[%s1009_s3 + $0x1] sm:$0x1] %v584_v44 }

</bundles_post_ra>
